<compile_context>
chip_gen: v7x
topology: tpu7x:2x2x1
jax: 0.10.0
libtpu: 0.0.40
codegen_flags: <defaults>
</compile_context>

<pallas_src>
import functools
import math

import jax
import jax.numpy as jnp
from jax.experimental import pallas as pl
from jax.experimental.pallas import tpu as pltpu

# ---------------- model hyper-parameters (small synthetic config) ----------------
D_MODEL = 32
NHEAD = 4
HEAD_DIM = D_MODEL // NHEAD
DIM_FF = 64
LT = 8      # tgt sequence length
LM = 16     # memory sequence length
B = 2       # batch
LN_EPS = 1e-5
_GELU_C = math.sqrt(2.0 / math.pi)


# ------------------------------- shared math helpers -------------------------------
def _gelu_tanh(h):
    # tanh-approx GELU (EUP tanh).
    # TODO(synk): torch F.gelu defaults to the exact erf form; tanh approx differs ~1e-3.
    return 0.5 * h * (1.0 + jnp.tanh(_GELU_C * (h + 0.044715 * h * h * h)))


def _layer_norm_ref(y, g, b):
    mu = jnp.mean(y, axis=-1, keepdims=True)
    var = jnp.mean(jnp.square(y - mu), axis=-1, keepdims=True)
    return (y - mu) * jax.lax.rsqrt(var + LN_EPS) * g + b


# ---------------------------------- fused kernel ----------------------------------
def _decoder_layer_kernel(tgt_ref, mem_ref, w_in_ref, w_out_ref, w2_ref, bvec_ref,
                          out_ref, *, nhead, batch, lt, lm):
    f32 = jnp.float32
    bf16 = jnp.bfloat16
    D = tgt_ref.shape[-1]
    dh = D // nhead
    dff = w2_ref.shape[0]
    scale = 1.0 / math.sqrt(dh)

    # ---- static lane offsets into the packed weight slab / bias vector ----
    WIN_SA_QKV, WIN_CA_Q, WIN_CA_KV, WIN_W1 = 0, 3 * D, 4 * D, 6 * D
    o = 0
    OFF_SA_BQKV = o; o += 3 * D
    OFF_CA_BQ = o;   o += D
    OFF_CA_BKV = o;  o += 2 * D
    OFF_B1 = o;      o += dff
    OFF_SA_BO = o;   o += D
    OFF_CA_BO = o;   o += D
    OFF_B2 = o;      o += D
    OFF_LN1G = o;    o += D
    OFF_LN1B = o;    o += D
    OFF_LN2G = o;    o += D
    OFF_LN2B = o;    o += D
    OFF_LN3G = o;    o += D
    OFF_LN3B = o;    o += D

    def bias(off, width):
        # Point-of-use load of one (1, width) row; broadcasts over the folded batch rows.
        return bvec_ref[:, off:off + width]

    def mm(a, w_bf16):
        # bf16 MXU path, f32 accumulation; elementwise math stays f32.
        return jnp.dot(a.astype(bf16), w_bf16, preferred_element_type=f32)

    def layer_norm(y, g_off, b_off):
        mu = jnp.mean(y, axis=-1, keepdims=True)
        var = jnp.mean(jnp.square(y - mu), axis=-1, keepdims=True)
        return (y - mu) * jax.lax.rsqrt(var + LN_EPS) * bias(g_off, D) + bias(b_off, D)

    def attn(q, k, v, lk, wo_col, bo_off):
        # q: (B*lt, D); k, v: (B*lk, D) — batch folded into rows (sublane-aligned blocks).
        # Heads are a static loop; batch is a dot_general batch dim; the output projection
        # is folded per head (no lane concatenation).
        q3 = q.reshape(batch, lt, D)
        k3 = k.reshape(batch, lk, D)
        v3 = v.reshape(batch, lk, D)
        acc = jnp.zeros((batch * lt, D), f32)
        for h in range(nhead):                                   # static unroll, nhead = 4
            sl = slice(h * dh, (h + 1) * dh)                     # lane slice at head_dim mult.
            qh = q3[:, :, sl].astype(bf16)
            kh = k3[:, :, sl].astype(bf16)
            vh = v3[:, :, sl].astype(bf16)
            s = jnp.einsum("bqd,bkd->bqk", qh, kh,
                           preferred_element_type=f32) * scale   # (B, lt, lk)
            s = s - jnp.max(s, axis=-1, keepdims=True)
            p = jnp.exp(s)
            p = p * pl.reciprocal(jnp.sum(p, axis=-1, keepdims=True), approx=True)
            ctx = jnp.einsum("bqk,bkd->bqd", p.astype(bf16), vh,
                             preferred_element_type=f32)          # (B, lt, dh)
            # point-of-use slice of the output projection rows for this head
            wo_h = w_out_ref[h * dh:(h + 1) * dh, wo_col:wo_col + D]   # (dh, D) bf16
            acc = acc + jnp.dot(ctx.reshape(batch * lt, dh).astype(bf16), wo_h,
                                preferred_element_type=f32)
        return acc + bias(bo_off, D)

    x = tgt_ref[...].astype(f32)     # (B*Lt, D)
    m = mem_ref[...].astype(f32)     # (B*Lm, D)

    # --- self-attention + residual + norm1 (projection on the folded slab) ---
    qkv = mm(x, w_in_ref[:, WIN_SA_QKV:WIN_SA_QKV + 3 * D]) + bias(OFF_SA_BQKV, 3 * D)
    sa = attn(qkv[:, 0:D], qkv[:, D:2 * D], qkv[:, 2 * D:3 * D], lt, 0, OFF_SA_BO)
    y = layer_norm(x + sa, OFF_LN1G, OFF_LN1B)

    # --- cross-attention (query = y, key/value = memory) + residual + norm2 ---
    qc = mm(y, w_in_ref[:, WIN_CA_Q:WIN_CA_Q + D]) + bias(OFF_CA_BQ, D)
    kvc = mm(m, w_in_ref[:, WIN_CA_KV:WIN_CA_KV + 2 * D]) + bias(OFF_CA_BKV, 2 * D)
    ca = attn(qc, kvc[:, 0:D], kvc[:, D:2 * D], lm, D, OFF_CA_BO)
    y = layer_norm(y + ca, OFF_LN2G, OFF_LN2B)

    # --- feed-forward (linear1 -> gelu -> linear2) + residual + norm3 ---
    h = _gelu_tanh(mm(y, w_in_ref[:, WIN_W1:WIN_W1 + dff]) + bias(OFF_B1, dff))
    ff = mm(h, w2_ref[...]) + bias(OFF_B2, D)
    y = layer_norm(y + ff, OFF_LN3G, OFF_LN3B)

    out_ref[...] = y.astype(out_ref.dtype)


# ------------------------------ module composition ------------------------------
def transformer_decoder_layer(tgt, memory, params):
    """tgt: (Lt, B, D), memory: (Lm, B, D) -> (Lt, B, D). Dropouts are identity (eval)."""
    Lt, Bb, D = tgt.shape
    Lm = memory.shape[0]
    sa, ca = params["self_attn"], params["cross_attn"]

    # Pack all D-row projection weights into one bf16 slab (half the DMA bytes, MXU-native).
    w_in = jnp.concatenate(
        [sa["wq"], sa["wk"], sa["wv"], ca["wq"], ca["wk"], ca["wv"], params["w1"]],
        axis=1).astype(jnp.bfloat16)                                        # (D, 6D+DFF)=(32,256)
    w_out = jnp.concatenate([sa["wo"], ca["wo"]], axis=1).astype(jnp.bfloat16)  # (32, 64)
    w2 = params["w2"].astype(jnp.bfloat16)                                  # (64, 32)

    # Every bias / LayerNorm vector packed into one row -> a single DMA.
    bvec = jnp.concatenate(
        [sa["bq"], sa["bk"], sa["bv"],
         ca["bq"], ca["bk"], ca["bv"],
         params["b1"],
         sa["bo"], ca["bo"], params["b2"],
         params["ln1_g"], params["ln1_b"],
         params["ln2_g"], params["ln2_b"],
         params["ln3_g"], params["ln3_b"]], axis=1).astype(jnp.float32)     # (1, 544)

    # Batch-major, batch folded into rows (per-batch blocks are sublane-aligned: Lt, Lm mult of 8).
    tgt2d = jnp.transpose(tgt, (1, 0, 2)).reshape(Bb * Lt, D)
    mem2d = jnp.transpose(memory, (1, 0, 2)).reshape(Bb * Lm, D)

    out2d = pl.pallas_call(
        functools.partial(_decoder_layer_kernel, nhead=NHEAD, batch=Bb, lt=Lt, lm=Lm),
        out_shape=jax.ShapeDtypeStruct((Bb * Lt, D), tgt.dtype),
        in_specs=[pl.BlockSpec(memory_space=pltpu.MemorySpace.VMEM)] * 6,
        out_specs=pl.BlockSpec(memory_space=pltpu.MemorySpace.VMEM),
    )(tgt2d, mem2d, w_in, w_out, w2, bvec)
    # TODO(synk): at production sizes (and for v7x's 2 TensorCores / 64 MiB VMEM), replace the
    #             grid=() all-in-VMEM layout with a ("parallel",) grid over batch / Lt tiles
    #             plus BlockSpec pipelining and an explicit vmem_limit_bytes.
    return jnp.transpose(out2d.reshape(Bb, Lt, D), (1, 0, 2))


# ------------------------------ pure-JAX reference ------------------------------
def _mha_ref(query, key, value, p, nhead):
    Lq, Bb, D = query.shape
    Lk = key.shape[0]
    dh = D // nhead
    q = (query @ p["wq"] + p["bq"]).reshape(Lq, Bb, nhead, dh)
    k = (key @ p["wk"] + p["bk"]).reshape(Lk, Bb, nhead, dh)
    v = (value @ p["wv"] + p["bv"]).reshape(Lk, Bb, nhead, dh)
    s = jnp.einsum("qbhd,kbhd->bhqk", q, k) / math.sqrt(dh)
    a = jax.nn.softmax(s, axis=-1)
    o = jnp.einsum("bhqk,kbhd->qbhd", a, v).reshape(Lq, Bb, D)
    return o @ p["wo"] + p["bo"]


def decoder_layer_reference(tgt, memory, params):
    x = tgt
    x = _layer_norm_ref(x + _mha_ref(x, x, x, params["self_attn"], NHEAD),
                        params["ln1_g"], params["ln1_b"])
    x = _layer_norm_ref(x + _mha_ref(x, memory, memory, params["cross_attn"], NHEAD),
                        params["ln2_g"], params["ln2_b"])
    h = _gelu_tanh(x @ params["w1"] + params["b1"])
    x = _layer_norm_ref(x + (h @ params["w2"] + params["b2"]),
                        params["ln3_g"], params["ln3_b"])
    return x


# ---------------------------------- params ----------------------------------
def init_params(key):
    keys = iter(jax.random.split(key, 32))

    def w(shape, scale=0.05):
        return jax.random.normal(next(keys), shape, jnp.float32) * scale

    def attn_block():
        return dict(
            wq=w((D_MODEL, D_MODEL)), bq=w((1, D_MODEL), 0.02),
            wk=w((D_MODEL, D_MODEL)), bk=w((1, D_MODEL), 0.02),
            wv=w((D_MODEL, D_MODEL)), bv=w((1, D_MODEL), 0.02),
            wo=w((D_MODEL, D_MODEL)), bo=w((1, D_MODEL), 0.02),
        )

    return dict(
        self_attn=attn_block(),
        cross_attn=attn_block(),
        w1=w((D_MODEL, DIM_FF)), b1=w((1, DIM_FF), 0.02),
        w2=w((DIM_FF, D_MODEL)), b2=w((1, D_MODEL), 0.02),
        ln1_g=jnp.ones((1, D_MODEL), jnp.float32), ln1_b=jnp.zeros((1, D_MODEL), jnp.float32),
        ln2_g=jnp.ones((1, D_MODEL), jnp.float32), ln2_b=jnp.zeros((1, D_MODEL), jnp.float32),
        ln3_g=jnp.ones((1, D_MODEL), jnp.float32), ln3_b=jnp.zeros((1, D_MODEL), jnp.float32),
    )


if __name__ == "__main__":
    root = jax.random.PRNGKey(0)
    kp, kt, km = jax.random.split(root, 3)
    params = init_params(kp)
    tgt = jax.random.normal(kt, (LT, B, D_MODEL), jnp.float32)
    memory = jax.random.normal(km, (LM, B, D_MODEL), jnp.float32)

    fwd = jax.jit(transformer_decoder_layer)
    out = fwd(tgt, memory, params)
    jax.block_until_ready(out)

    ref = decoder_layer_reference(tgt, memory, params)
    assert out.shape == (LT, B, D_MODEL)
    assert bool(jnp.all(jnp.isfinite(out)))
    max_err = float(jnp.max(jnp.abs(out - ref)))
    assert bool(jnp.allclose(out, ref, atol=2e-2, rtol=2e-2)), max_err
    print("KERNEL_OK")
</pallas_src>

<mosaic_0001>
module attributes {stable_mosaic.version = 11 : i64} {
  func.func @_decoder_layer_kernel(%arg0: memref<16x32xf32, #tpu.memory_space<vmem>>, %arg1: memref<32x32xf32, #tpu.memory_space<vmem>>, %arg2: memref<32x256xbf16, #tpu.memory_space<vmem>>, %arg3: memref<32x64xbf16, #tpu.memory_space<vmem>>, %arg4: memref<64x32xbf16, #tpu.memory_space<vmem>>, %arg5: memref<1x544xf32, #tpu.memory_space<vmem>>, %arg6: memref<16x32xf32, #tpu.memory_space<vmem>>) attributes {dimension_semantics = [], scalar_prefetch = 0 : i64, scratch_operands = 0 : i64, tpu.core_type = #tpu.core_type<tc>} {
    %c0 = arith.constant 0 : index
    %c0_0 = arith.constant 0 : index
    %0 = vector.load %arg0[%c0, %c0_0] : memref<16x32xf32, #tpu.memory_space<vmem>>, vector<16x32xf32>
    %c0_1 = arith.constant 0 : index
    %c0_2 = arith.constant 0 : index
    %1 = vector.load %arg1[%c0_1, %c0_2] : memref<32x32xf32, #tpu.memory_space<vmem>>, vector<32x32xf32>
    %c0_3 = arith.constant 0 : index
    %c0_4 = arith.constant 0 : index
    %2 = vector.load %arg2[%c0_3, %c0_4] : memref<32x256xbf16, #tpu.memory_space<vmem>>, vector<32x96xbf16>
    %3 = arith.truncf %0 : vector<16x32xf32> to vector<16x32xbf16>
    %cst = arith.constant dense<0.000000e+00> : vector<16x96xf32>
    %4 = tpu.matmul %3, %2, %cst {dimension_numbers = #tpu.dot_dimension_numbers<[1], [0], [0], [1], [0, 0, 1, 1], [], []>} : vector<16x32xbf16>, vector<32x96xbf16>, vector<16x96xf32> -> vector<16x96xf32>
    %c0_5 = arith.constant 0 : index
    %c0_6 = arith.constant 0 : index
    %5 = vector.load %arg5[%c0_5, %c0_6] : memref<1x544xf32, #tpu.memory_space<vmem>>, vector<1x96xf32>
    %6 = vector.broadcast %5 : vector<1x96xf32> to vector<16x96xf32>
    %7 = arith.addf %4, %6 : vector<16x96xf32>
    %8 = vector.extract_strided_slice %7 {offsets = [0, 0], sizes = [16, 32], strides = [1, 1]} : vector<16x96xf32> to vector<16x32xf32>
    %9 = vector.extract_strided_slice %7 {offsets = [0, 32], sizes = [16, 32], strides = [1, 1]} : vector<16x96xf32> to vector<16x32xf32>
    %10 = vector.extract_strided_slice %7 {offsets = [0, 64], sizes = [16, 32], strides = [1, 1]} : vector<16x96xf32> to vector<16x32xf32>
    %11 = vector.shape_cast %8 : vector<16x32xf32> to vector<2x8x32xf32>
    %12 = vector.shape_cast %9 : vector<16x32xf32> to vector<2x8x32xf32>
    %13 = vector.shape_cast %10 : vector<16x32xf32> to vector<2x8x32xf32>
    %cst_7 = arith.constant 0.000000e+00 : f32
    %14 = vector.broadcast %cst_7 : f32 to vector<16x32xf32>
    %15 = vector.extract_strided_slice %11 {offsets = [0, 0, 0], sizes = [2, 8, 8], strides = [1, 1, 1]} : vector<2x8x32xf32> to vector<2x8x8xf32>
    %16 = arith.truncf %15 : vector<2x8x8xf32> to vector<2x8x8xbf16>
    %17 = vector.extract_strided_slice %12 {offsets = [0, 0, 0], sizes = [2, 8, 8], strides = [1, 1, 1]} : vector<2x8x32xf32> to vector<2x8x8xf32>
    %18 = arith.truncf %17 : vector<2x8x8xf32> to vector<2x8x8xbf16>
    %19 = vector.extract_strided_slice %13 {offsets = [0, 0, 0], sizes = [2, 8, 8], strides = [1, 1, 1]} : vector<2x8x32xf32> to vector<2x8x8xf32>
    %20 = arith.truncf %19 : vector<2x8x8xf32> to vector<2x8x8xbf16>
    "tpu.trace_start"() <{level = 10 : i32, message = "bqd,bkd->bqk"}> : () -> ()
    %cst_8 = arith.constant dense<0.000000e+00> : vector<2x8x8xf32>
    %21 = tpu.matmul %16, %18, %cst_8 {dimension_numbers = #tpu.dot_dimension_numbers<[2], [2], [1], [1], [0, 0, 0, 1, 1, 1], [0], [0]>} : vector<2x8x8xbf16>, vector<2x8x8xbf16>, vector<2x8x8xf32> -> vector<2x8x8xf32>
    "tpu.trace_stop"() : () -> ()
    %cst_9 = arith.constant 0.353553385 : f32
    %22 = vector.broadcast %cst_9 : f32 to vector<2x8x8xf32>
    %23 = arith.mulf %21, %22 : vector<2x8x8xf32>
    %cst_10 = arith.constant dense<0xFF800000> : vector<2x8xf32>
    %24 = vector.multi_reduction <maximumf>, %23, %cst_10 [2] : vector<2x8x8xf32> to vector<2x8xf32>
    %25 = vector.shape_cast %24 : vector<2x8xf32> to vector<2x8x1xf32>
    %26 = vector.broadcast %25 : vector<2x8x1xf32> to vector<2x8x8xf32>
    %27 = arith.subf %23, %26 : vector<2x8x8xf32>
    %28 = math.exp %27 : vector<2x8x8xf32>
    %cst_11 = arith.constant dense<0.000000e+00> : vector<2x8xf32>
    %29 = vector.multi_reduction <add>, %28, %cst_11 [2] : vector<2x8x8xf32> to vector<2x8xf32>
    %30 = vector.shape_cast %29 : vector<2x8xf32> to vector<2x8x1xf32>
    %31 = tpu.reciprocal %30 {approx = true} : vector<2x8x1xf32> -> vector<2x8x1xf32>
    %32 = vector.broadcast %31 : vector<2x8x1xf32> to vector<2x8x8xf32>
    %33 = arith.mulf %28, %32 : vector<2x8x8xf32>
    %34 = arith.truncf %33 : vector<2x8x8xf32> to vector<2x8x8xbf16>
    "tpu.trace_start"() <{level = 10 : i32, message = "bqk,bkd->bqd"}> : () -> ()
    %cst_12 = arith.constant dense<0.000000e+00> : vector<2x8x8xf32>
    %35 = tpu.matmul %34, %20, %cst_12 {dimension_numbers = #tpu.dot_dimension_numbers<[2], [1], [1], [2], [0, 0, 0, 1, 1, 2], [0], [0]>} : vector<2x8x8xbf16>, vector<2x8x8xbf16>, vector<2x8x8xf32> -> vector<2x8x8xf32>
    "tpu.trace_stop"() : () -> ()
    %c0_13 = arith.constant 0 : index
    %c0_14 = arith.constant 0 : index
    %36 = vector.load %arg3[%c0_13, %c0_14] : memref<32x64xbf16, #tpu.memory_space<vmem>>, vector<8x32xbf16>
    %37 = vector.shape_cast %35 : vector<2x8x8xf32> to vector<16x8xf32>
    %38 = arith.truncf %37 : vector<16x8xf32> to vector<16x8xbf16>
    %cst_15 = arith.constant dense<0.000000e+00> : vector<16x32xf32>
    %39 = tpu.matmul %38, %36, %cst_15 {dimension_numbers = #tpu.dot_dimension_numbers<[1], [0], [0], [1], [0, 0, 1, 1], [], []>} : vector<16x8xbf16>, vector<8x32xbf16>, vector<16x32xf32> -> vector<16x32xf32>
    %40 = arith.addf %14, %39 : vector<16x32xf32>
    %41 = vector.extract_strided_slice %11 {offsets = [0, 0, 8], sizes = [2, 8, 8], strides = [1, 1, 1]} : vector<2x8x32xf32> to vector<2x8x8xf32>
    %42 = arith.truncf %41 : vector<2x8x8xf32> to vector<2x8x8xbf16>
    %43 = vector.extract_strided_slice %12 {offsets = [0, 0, 8], sizes = [2, 8, 8], strides = [1, 1, 1]} : vector<2x8x32xf32> to vector<2x8x8xf32>
    %44 = arith.truncf %43 : vector<2x8x8xf32> to vector<2x8x8xbf16>
    %45 = vector.extract_strided_slice %13 {offsets = [0, 0, 8], sizes = [2, 8, 8], strides = [1, 1, 1]} : vector<2x8x32xf32> to vector<2x8x8xf32>
    %46 = arith.truncf %45 : vector<2x8x8xf32> to vector<2x8x8xbf16>
    "tpu.trace_start"() <{level = 10 : i32, message = "bqd,bkd->bqk"}> : () -> ()
    %cst_16 = arith.constant dense<0.000000e+00> : vector<2x8x8xf32>
    %47 = tpu.matmul %42, %44, %cst_16 {dimension_numbers = #tpu.dot_dimension_numbers<[2], [2], [1], [1], [0, 0, 0, 1, 1, 1], [0], [0]>} : vector<2x8x8xbf16>, vector<2x8x8xbf16>, vector<2x8x8xf32> -> vector<2x8x8xf32>
    "tpu.trace_stop"() : () -> ()
    %cst_17 = arith.constant 0.353553385 : f32
    %48 = vector.broadcast %cst_17 : f32 to vector<2x8x8xf32>
    %49 = arith.mulf %47, %48 : vector<2x8x8xf32>
    %cst_18 = arith.constant dense<0xFF800000> : vector<2x8xf32>
    %50 = vector.multi_reduction <maximumf>, %49, %cst_18 [2] : vector<2x8x8xf32> to vector<2x8xf32>
    %51 = vector.shape_cast %50 : vector<2x8xf32> to vector<2x8x1xf32>
    %52 = vector.broadcast %51 : vector<2x8x1xf32> to vector<2x8x8xf32>
    %53 = arith.subf %49, %52 : vector<2x8x8xf32>
    %54 = math.exp %53 : vector<2x8x8xf32>
    %cst_19 = arith.constant dense<0.000000e+00> : vector<2x8xf32>
    %55 = vector.multi_reduction <add>, %54, %cst_19 [2] : vector<2x8x8xf32> to vector<2x8xf32>
    %56 = vector.shape_cast %55 : vector<2x8xf32> to vector<2x8x1xf32>
    %57 = tpu.reciprocal %56 {approx = true} : vector<2x8x1xf32> -> vector<2x8x1xf32>
    %58 = vector.broadcast %57 : vector<2x8x1xf32> to vector<2x8x8xf32>
    %59 = arith.mulf %54, %58 : vector<2x8x8xf32>
    %60 = arith.truncf %59 : vector<2x8x8xf32> to vector<2x8x8xbf16>
    "tpu.trace_start"() <{level = 10 : i32, message = "bqk,bkd->bqd"}> : () -> ()
    %cst_20 = arith.constant dense<0.000000e+00> : vector<2x8x8xf32>
    %61 = tpu.matmul %60, %46, %cst_20 {dimension_numbers = #tpu.dot_dimension_numbers<[2], [1], [1], [2], [0, 0, 0, 1, 1, 2], [0], [0]>} : vector<2x8x8xbf16>, vector<2x8x8xbf16>, vector<2x8x8xf32> -> vector<2x8x8xf32>
    "tpu.trace_stop"() : () -> ()
    %c8 = arith.constant 8 : index
    %c0_21 = arith.constant 0 : index
    %62 = vector.load %arg3[%c8, %c0_21] : memref<32x64xbf16, #tpu.memory_space<vmem>>, vector<8x32xbf16>
    %63 = vector.shape_cast %61 : vector<2x8x8xf32> to vector<16x8xf32>
    %64 = arith.truncf %63 : vector<16x8xf32> to vector<16x8xbf16>
    %cst_22 = arith.constant dense<0.000000e+00> : vector<16x32xf32>
    %65 = tpu.matmul %64, %62, %cst_22 {dimension_numbers = #tpu.dot_dimension_numbers<[1], [0], [0], [1], [0, 0, 1, 1], [], []>} : vector<16x8xbf16>, vector<8x32xbf16>, vector<16x32xf32> -> vector<16x32xf32>
    %66 = arith.addf %40, %65 : vector<16x32xf32>
    %67 = vector.extract_strided_slice %11 {offsets = [0, 0, 16], sizes = [2, 8, 8], strides = [1, 1, 1]} : vector<2x8x32xf32> to vector<2x8x8xf32>
    %68 = arith.truncf %67 : vector<2x8x8xf32> to vector<2x8x8xbf16>
    %69 = vector.extract_strided_slice %12 {offsets = [0, 0, 16], sizes = [2, 8, 8], strides = [1, 1, 1]} : vector<2x8x32xf32> to vector<2x8x8xf32>
    %70 = arith.truncf %69 : vector<2x8x8xf32> to vector<2x8x8xbf16>
    %71 = vector.extract_strided_slice %13 {offsets = [0, 0, 16], sizes = [2, 8, 8], strides = [1, 1, 1]} : vector<2x8x32xf32> to vector<2x8x8xf32>
    %72 = arith.truncf %71 : vector<2x8x8xf32> to vector<2x8x8xbf16>
    "tpu.trace_start"() <{level = 10 : i32, message = "bqd,bkd->bqk"}> : () -> ()
    %cst_23 = arith.constant dense<0.000000e+00> : vector<2x8x8xf32>
    %73 = tpu.matmul %68, %70, %cst_23 {dimension_numbers = #tpu.dot_dimension_numbers<[2], [2], [1], [1], [0, 0, 0, 1, 1, 1], [0], [0]>} : vector<2x8x8xbf16>, vector<2x8x8xbf16>, vector<2x8x8xf32> -> vector<2x8x8xf32>
    "tpu.trace_stop"() : () -> ()
    %cst_24 = arith.constant 0.353553385 : f32
    %74 = vector.broadcast %cst_24 : f32 to vector<2x8x8xf32>
    %75 = arith.mulf %73, %74 : vector<2x8x8xf32>
    %cst_25 = arith.constant dense<0xFF800000> : vector<2x8xf32>
    %76 = vector.multi_reduction <maximumf>, %75, %cst_25 [2] : vector<2x8x8xf32> to vector<2x8xf32>
    %77 = vector.shape_cast %76 : vector<2x8xf32> to vector<2x8x1xf32>
    %78 = vector.broadcast %77 : vector<2x8x1xf32> to vector<2x8x8xf32>
    %79 = arith.subf %75, %78 : vector<2x8x8xf32>
    %80 = math.exp %79 : vector<2x8x8xf32>
    %cst_26 = arith.constant dense<0.000000e+00> : vector<2x8xf32>
    %81 = vector.multi_reduction <add>, %80, %cst_26 [2] : vector<2x8x8xf32> to vector<2x8xf32>
    %82 = vector.shape_cast %81 : vector<2x8xf32> to vector<2x8x1xf32>
    %83 = tpu.reciprocal %82 {approx = true} : vector<2x8x1xf32> -> vector<2x8x1xf32>
    %84 = vector.broadcast %83 : vector<2x8x1xf32> to vector<2x8x8xf32>
    %85 = arith.mulf %80, %84 : vector<2x8x8xf32>
    %86 = arith.truncf %85 : vector<2x8x8xf32> to vector<2x8x8xbf16>
    "tpu.trace_start"() <{level = 10 : i32, message = "bqk,bkd->bqd"}> : () -> ()
    %cst_27 = arith.constant dense<0.000000e+00> : vector<2x8x8xf32>
    %87 = tpu.matmul %86, %72, %cst_27 {dimension_numbers = #tpu.dot_dimension_numbers<[2], [1], [1], [2], [0, 0, 0, 1, 1, 2], [0], [0]>} : vector<2x8x8xbf16>, vector<2x8x8xbf16>, vector<2x8x8xf32> -> vector<2x8x8xf32>
    "tpu.trace_stop"() : () -> ()
    %c16 = arith.constant 16 : index
    %c0_28 = arith.constant 0 : index
    %88 = vector.load %arg3[%c16, %c0_28] : memref<32x64xbf16, #tpu.memory_space<vmem>>, vector<8x32xbf16>
    %89 = vector.shape_cast %87 : vector<2x8x8xf32> to vector<16x8xf32>
    %90 = arith.truncf %89 : vector<16x8xf32> to vector<16x8xbf16>
    %cst_29 = arith.constant dense<0.000000e+00> : vector<16x32xf32>
    %91 = tpu.matmul %90, %88, %cst_29 {dimension_numbers = #tpu.dot_dimension_numbers<[1], [0], [0], [1], [0, 0, 1, 1], [], []>} : vector<16x8xbf16>, vector<8x32xbf16>, vector<16x32xf32> -> vector<16x32xf32>
    %92 = arith.addf %66, %91 : vector<16x32xf32>
    %93 = vector.extract_strided_slice %11 {offsets = [0, 0, 24], sizes = [2, 8, 8], strides = [1, 1, 1]} : vector<2x8x32xf32> to vector<2x8x8xf32>
    %94 = arith.truncf %93 : vector<2x8x8xf32> to vector<2x8x8xbf16>
    %95 = vector.extract_strided_slice %12 {offsets = [0, 0, 24], sizes = [2, 8, 8], strides = [1, 1, 1]} : vector<2x8x32xf32> to vector<2x8x8xf32>
    %96 = arith.truncf %95 : vector<2x8x8xf32> to vector<2x8x8xbf16>
    %97 = vector.extract_strided_slice %13 {offsets = [0, 0, 24], sizes = [2, 8, 8], strides = [1, 1, 1]} : vector<2x8x32xf32> to vector<2x8x8xf32>
    %98 = arith.truncf %97 : vector<2x8x8xf32> to vector<2x8x8xbf16>
    "tpu.trace_start"() <{level = 10 : i32, message = "bqd,bkd->bqk"}> : () -> ()
    %cst_30 = arith.constant dense<0.000000e+00> : vector<2x8x8xf32>
    %99 = tpu.matmul %94, %96, %cst_30 {dimension_numbers = #tpu.dot_dimension_numbers<[2], [2], [1], [1], [0, 0, 0, 1, 1, 1], [0], [0]>} : vector<2x8x8xbf16>, vector<2x8x8xbf16>, vector<2x8x8xf32> -> vector<2x8x8xf32>
    "tpu.trace_stop"() : () -> ()
    %cst_31 = arith.constant 0.353553385 : f32
    %100 = vector.broadcast %cst_31 : f32 to vector<2x8x8xf32>
    %101 = arith.mulf %99, %100 : vector<2x8x8xf32>
    %cst_32 = arith.constant dense<0xFF800000> : vector<2x8xf32>
    %102 = vector.multi_reduction <maximumf>, %101, %cst_32 [2] : vector<2x8x8xf32> to vector<2x8xf32>
    %103 = vector.shape_cast %102 : vector<2x8xf32> to vector<2x8x1xf32>
    %104 = vector.broadcast %103 : vector<2x8x1xf32> to vector<2x8x8xf32>
    %105 = arith.subf %101, %104 : vector<2x8x8xf32>
    %106 = math.exp %105 : vector<2x8x8xf32>
    %cst_33 = arith.constant dense<0.000000e+00> : vector<2x8xf32>
    %107 = vector.multi_reduction <add>, %106, %cst_33 [2] : vector<2x8x8xf32> to vector<2x8xf32>
    %108 = vector.shape_cast %107 : vector<2x8xf32> to vector<2x8x1xf32>
    %109 = tpu.reciprocal %108 {approx = true} : vector<2x8x1xf32> -> vector<2x8x1xf32>
    %110 = vector.broadcast %109 : vector<2x8x1xf32> to vector<2x8x8xf32>
    %111 = arith.mulf %106, %110 : vector<2x8x8xf32>
    %112 = arith.truncf %111 : vector<2x8x8xf32> to vector<2x8x8xbf16>
    "tpu.trace_start"() <{level = 10 : i32, message = "bqk,bkd->bqd"}> : () -> ()
    %cst_34 = arith.constant dense<0.000000e+00> : vector<2x8x8xf32>
    %113 = tpu.matmul %112, %98, %cst_34 {dimension_numbers = #tpu.dot_dimension_numbers<[2], [1], [1], [2], [0, 0, 0, 1, 1, 2], [0], [0]>} : vector<2x8x8xbf16>, vector<2x8x8xbf16>, vector<2x8x8xf32> -> vector<2x8x8xf32>
    "tpu.trace_stop"() : () -> ()
    %c24 = arith.constant 24 : index
    %c0_35 = arith.constant 0 : index
    %114 = vector.load %arg3[%c24, %c0_35] : memref<32x64xbf16, #tpu.memory_space<vmem>>, vector<8x32xbf16>
    %115 = vector.shape_cast %113 : vector<2x8x8xf32> to vector<16x8xf32>
    %116 = arith.truncf %115 : vector<16x8xf32> to vector<16x8xbf16>
    %cst_36 = arith.constant dense<0.000000e+00> : vector<16x32xf32>
    %117 = tpu.matmul %116, %114, %cst_36 {dimension_numbers = #tpu.dot_dimension_numbers<[1], [0], [0], [1], [0, 0, 1, 1], [], []>} : vector<16x8xbf16>, vector<8x32xbf16>, vector<16x32xf32> -> vector<16x32xf32>
    %118 = arith.addf %92, %117 : vector<16x32xf32>
    %c0_37 = arith.constant 0 : index
    %c256 = arith.constant 256 : index
    %119 = vector.load %arg5[%c0_37, %c256] : memref<1x544xf32, #tpu.memory_space<vmem>>, vector<1x32xf32>
    %120 = vector.broadcast %119 : vector<1x32xf32> to vector<16x32xf32>
    %121 = arith.addf %118, %120 : vector<16x32xf32>
    %122 = arith.addf %0, %121 : vector<16x32xf32>
    %cst_38 = arith.constant dense<0.000000e+00> : vector<16xf32>
    %123 = vector.multi_reduction <add>, %122, %cst_38 [1] : vector<16x32xf32> to vector<16xf32>
    %124 = vector.shape_cast %123 : vector<16xf32> to vector<16x1xf32>
    %cst_39 = arith.constant 3.200000e+01 : f32
    %125 = vector.broadcast %cst_39 : f32 to vector<16x1xf32>
    %126 = arith.divf %124, %125 : vector<16x1xf32>
    %127 = vector.broadcast %126 : vector<16x1xf32> to vector<16x32xf32>
    %128 = arith.subf %122, %127 : vector<16x32xf32>
    %129 = arith.mulf %128, %128 : vector<16x32xf32>
    %cst_40 = arith.constant dense<0.000000e+00> : vector<16xf32>
    %130 = vector.multi_reduction <add>, %129, %cst_40 [1] : vector<16x32xf32> to vector<16xf32>
    %131 = vector.shape_cast %130 : vector<16xf32> to vector<16x1xf32>
    %cst_41 = arith.constant 3.200000e+01 : f32
    %132 = vector.broadcast %cst_41 : f32 to vector<16x1xf32>
    %133 = arith.divf %131, %132 : vector<16x1xf32>
    %134 = vector.broadcast %126 : vector<16x1xf32> to vector<16x32xf32>
    %135 = arith.subf %122, %134 : vector<16x32xf32>
    %cst_42 = arith.constant 9.99999974E-6 : f32
    %136 = vector.broadcast %cst_42 : f32 to vector<16x1xf32>
    %137 = arith.addf %133, %136 : vector<16x1xf32>
    %138 = math.rsqrt %137 : vector<16x1xf32>
    %139 = vector.broadcast %138 : vector<16x1xf32> to vector<16x32xf32>
    %140 = arith.mulf %135, %139 : vector<16x32xf32>
    %c0_43 = arith.constant 0 : index
    %c352 = arith.constant 352 : index
    %141 = vector.load %arg5[%c0_43, %c352] : memref<1x544xf32, #tpu.memory_space<vmem>>, vector<1x32xf32>
    %142 = vector.broadcast %141 : vector<1x32xf32> to vector<16x32xf32>
    %143 = arith.mulf %140, %142 : vector<16x32xf32>
    %c0_44 = arith.constant 0 : index
    %c384 = arith.constant 384 : index
    %144 = vector.load %arg5[%c0_44, %c384] : memref<1x544xf32, #tpu.memory_space<vmem>>, vector<1x32xf32>
    %145 = vector.broadcast %144 : vector<1x32xf32> to vector<16x32xf32>
    %146 = arith.addf %143, %145 : vector<16x32xf32>
    %c0_45 = arith.constant 0 : index
    %c96 = arith.constant 96 : index
    %147 = vector.load %arg2[%c0_45, %c96] : memref<32x256xbf16, #tpu.memory_space<vmem>>, vector<32x32xbf16>
    %148 = arith.truncf %146 : vector<16x32xf32> to vector<16x32xbf16>
    %cst_46 = arith.constant dense<0.000000e+00> : vector<16x32xf32>
    %149 = tpu.matmul %148, %147, %cst_46 {dimension_numbers = #tpu.dot_dimension_numbers<[1], [0], [0], [1], [0, 0, 1, 1], [], []>} : vector<16x32xbf16>, vector<32x32xbf16>, vector<16x32xf32> -> vector<16x32xf32>
    %c0_47 = arith.constant 0 : index
    %c96_48 = arith.constant 96 : index
    %150 = vector.load %arg5[%c0_47, %c96_48] : memref<1x544xf32, #tpu.memory_space<vmem>>, vector<1x32xf32>
    %151 = vector.broadcast %150 : vector<1x32xf32> to vector<16x32xf32>
    %152 = arith.addf %149, %151 : vector<16x32xf32>
    %c0_49 = arith.constant 0 : index
    %c128 = arith.constant 128 : index
    %153 = vector.load %arg2[%c0_49, %c128] : memref<32x256xbf16, #tpu.memory_space<vmem>>, vector<32x64xbf16>
    %154 = arith.truncf %1 : vector<32x32xf32> to vector<32x32xbf16>
    %cst_50 = arith.constant dense<0.000000e+00> : vector<32x64xf32>
    %155 = tpu.matmul %154, %153, %cst_50 {dimension_numbers = #tpu.dot_dimension_numbers<[1], [0], [0], [1], [0, 0, 1, 1], [], []>} : vector<32x32xbf16>, vector<32x64xbf16>, vector<32x64xf32> -> vector<32x64xf32>
    %c0_51 = arith.constant 0 : index
    %c128_52 = arith.constant 128 : index
    %156 = vector.load %arg5[%c0_51, %c128_52] : memref<1x544xf32, #tpu.memory_space<vmem>>, vector<1x64xf32>
    %157 = vector.broadcast %156 : vector<1x64xf32> to vector<32x64xf32>
    %158 = arith.addf %155, %157 : vector<32x64xf32>
    %159 = vector.extract_strided_slice %158 {offsets = [0, 0], sizes = [32, 32], strides = [1, 1]} : vector<32x64xf32> to vector<32x32xf32>
    %160 = vector.extract_strided_slice %158 {offsets = [0, 32], sizes = [32, 32], strides = [1, 1]} : vector<32x64xf32> to vector<32x32xf32>
    %161 = vector.shape_cast %152 : vector<16x32xf32> to vector<2x8x32xf32>
    %162 = vector.shape_cast %159 : vector<32x32xf32> to vector<2x16x32xf32>
    %163 = vector.shape_cast %160 : vector<32x32xf32> to vector<2x16x32xf32>
    %cst_53 = arith.constant 0.000000e+00 : f32
    %164 = vector.broadcast %cst_53 : f32 to vector<16x32xf32>
    %165 = vector.extract_strided_slice %161 {offsets = [0, 0, 0], sizes = [2, 8, 8], strides = [1, 1, 1]} : vector<2x8x32xf32> to vector<2x8x8xf32>
    %166 = arith.truncf %165 : vector<2x8x8xf32> to vector<2x8x8xbf16>
    %167 = vector.extract_strided_slice %162 {offsets = [0, 0, 0], sizes = [2, 16, 8], strides = [1, 1, 1]} : vector<2x16x32xf32> to vector<2x16x8xf32>
    %168 = arith.truncf %167 : vector<2x16x8xf32> to vector<2x16x8xbf16>
    %169 = vector.extract_strided_slice %163 {offsets = [0, 0, 0], sizes = [2, 16, 8], strides = [1, 1, 1]} : vector<2x16x32xf32> to vector<2x16x8xf32>
    %170 = arith.truncf %169 : vector<2x16x8xf32> to vector<2x16x8xbf16>
    "tpu.trace_start"() <{level = 10 : i32, message = "bqd,bkd->bqk"}> : () -> ()
    %cst_54 = arith.constant dense<0.000000e+00> : vector<2x8x16xf32>
    %171 = tpu.matmul %166, %168, %cst_54 {dimension_numbers = #tpu.dot_dimension_numbers<[2], [2], [1], [1], [0, 0, 0, 1, 1, 1], [0], [0]>} : vector<2x8x8xbf16>, vector<2x16x8xbf16>, vector<2x8x16xf32> -> vector<2x8x16xf32>
    "tpu.trace_stop"() : () -> ()
    %cst_55 = arith.constant 0.353553385 : f32
    %172 = vector.broadcast %cst_55 : f32 to vector<2x8x16xf32>
    %173 = arith.mulf %171, %172 : vector<2x8x16xf32>
    %cst_56 = arith.constant dense<0xFF800000> : vector<2x8xf32>
    %174 = vector.multi_reduction <maximumf>, %173, %cst_56 [2] : vector<2x8x16xf32> to vector<2x8xf32>
    %175 = vector.shape_cast %174 : vector<2x8xf32> to vector<2x8x1xf32>
    %176 = vector.broadcast %175 : vector<2x8x1xf32> to vector<2x8x16xf32>
    %177 = arith.subf %173, %176 : vector<2x8x16xf32>
    %178 = math.exp %177 : vector<2x8x16xf32>
    %cst_57 = arith.constant dense<0.000000e+00> : vector<2x8xf32>
    %179 = vector.multi_reduction <add>, %178, %cst_57 [2] : vector<2x8x16xf32> to vector<2x8xf32>
    %180 = vector.shape_cast %179 : vector<2x8xf32> to vector<2x8x1xf32>
    %181 = tpu.reciprocal %180 {approx = true} : vector<2x8x1xf32> -> vector<2x8x1xf32>
    %182 = vector.broadcast %181 : vector<2x8x1xf32> to vector<2x8x16xf32>
    %183 = arith.mulf %178, %182 : vector<2x8x16xf32>
    %184 = arith.truncf %183 : vector<2x8x16xf32> to vector<2x8x16xbf16>
    "tpu.trace_start"() <{level = 10 : i32, message = "bqk,bkd->bqd"}> : () -> ()
    %cst_58 = arith.constant dense<0.000000e+00> : vector<2x8x8xf32>
    %185 = tpu.matmul %184, %170, %cst_58 {dimension_numbers = #tpu.dot_dimension_numbers<[2], [1], [1], [2], [0, 0, 0, 1, 1, 2], [0], [0]>} : vector<2x8x16xbf16>, vector<2x16x8xbf16>, vector<2x8x8xf32> -> vector<2x8x8xf32>
    "tpu.trace_stop"() : () -> ()
    %c0_59 = arith.constant 0 : index
    %c32 = arith.constant 32 : index
    %186 = vector.load %arg3[%c0_59, %c32] : memref<32x64xbf16, #tpu.memory_space<vmem>>, vector<8x32xbf16>
    %187 = vector.shape_cast %185 : vector<2x8x8xf32> to vector<16x8xf32>
    %188 = arith.truncf %187 : vector<16x8xf32> to vector<16x8xbf16>
    %cst_60 = arith.constant dense<0.000000e+00> : vector<16x32xf32>
    %189 = tpu.matmul %188, %186, %cst_60 {dimension_numbers = #tpu.dot_dimension_numbers<[1], [0], [0], [1], [0, 0, 1, 1], [], []>} : vector<16x8xbf16>, vector<8x32xbf16>, vector<16x32xf32> -> vector<16x32xf32>
    %190 = arith.addf %164, %189 : vector<16x32xf32>
    %191 = vector.extract_strided_slice %161 {offsets = [0, 0, 8], sizes = [2, 8, 8], strides = [1, 1, 1]} : vector<2x8x32xf32> to vector<2x8x8xf32>
    %192 = arith.truncf %191 : vector<2x8x8xf32> to vector<2x8x8xbf16>
    %193 = vector.extract_strided_slice %162 {offsets = [0, 0, 8], sizes = [2, 16, 8], strides = [1, 1, 1]} : vector<2x16x32xf32> to vector<2x16x8xf32>
    %194 = arith.truncf %193 : vector<2x16x8xf32> to vector<2x16x8xbf16>
    %195 = vector.extract_strided_slice %163 {offsets = [0, 0, 8], sizes = [2, 16, 8], strides = [1, 1, 1]} : vector<2x16x32xf32> to vector<2x16x8xf32>
    %196 = arith.truncf %195 : vector<2x16x8xf32> to vector<2x16x8xbf16>
    "tpu.trace_start"() <{level = 10 : i32, message = "bqd,bkd->bqk"}> : () -> ()
    %cst_61 = arith.constant dense<0.000000e+00> : vector<2x8x16xf32>
    %197 = tpu.matmul %192, %194, %cst_61 {dimension_numbers = #tpu.dot_dimension_numbers<[2], [2], [1], [1], [0, 0, 0, 1, 1, 1], [0], [0]>} : vector<2x8x8xbf16>, vector<2x16x8xbf16>, vector<2x8x16xf32> -> vector<2x8x16xf32>
    "tpu.trace_stop"() : () -> ()
    %cst_62 = arith.constant 0.353553385 : f32
    %198 = vector.broadcast %cst_62 : f32 to vector<2x8x16xf32>
    %199 = arith.mulf %197, %198 : vector<2x8x16xf32>
    %cst_63 = arith.constant dense<0xFF800000> : vector<2x8xf32>
    %200 = vector.multi_reduction <maximumf>, %199, %cst_63 [2] : vector<2x8x16xf32> to vector<2x8xf32>
    %201 = vector.shape_cast %200 : vector<2x8xf32> to vector<2x8x1xf32>
    %202 = vector.broadcast %201 : vector<2x8x1xf32> to vector<2x8x16xf32>
    %203 = arith.subf %199, %202 : vector<2x8x16xf32>
    %204 = math.exp %203 : vector<2x8x16xf32>
    %cst_64 = arith.constant dense<0.000000e+00> : vector<2x8xf32>
    %205 = vector.multi_reduction <add>, %204, %cst_64 [2] : vector<2x8x16xf32> to vector<2x8xf32>
    %206 = vector.shape_cast %205 : vector<2x8xf32> to vector<2x8x1xf32>
    %207 = tpu.reciprocal %206 {approx = true} : vector<2x8x1xf32> -> vector<2x8x1xf32>
    %208 = vector.broadcast %207 : vector<2x8x1xf32> to vector<2x8x16xf32>
    %209 = arith.mulf %204, %208 : vector<2x8x16xf32>
    %210 = arith.truncf %209 : vector<2x8x16xf32> to vector<2x8x16xbf16>
    "tpu.trace_start"() <{level = 10 : i32, message = "bqk,bkd->bqd"}> : () -> ()
    %cst_65 = arith.constant dense<0.000000e+00> : vector<2x8x8xf32>
    %211 = tpu.matmul %210, %196, %cst_65 {dimension_numbers = #tpu.dot_dimension_numbers<[2], [1], [1], [2], [0, 0, 0, 1, 1, 2], [0], [0]>} : vector<2x8x16xbf16>, vector<2x16x8xbf16>, vector<2x8x8xf32> -> vector<2x8x8xf32>
    "tpu.trace_stop"() : () -> ()
    %c8_66 = arith.constant 8 : index
    %c32_67 = arith.constant 32 : index
    %212 = vector.load %arg3[%c8_66, %c32_67] : memref<32x64xbf16, #tpu.memory_space<vmem>>, vector<8x32xbf16>
    %213 = vector.shape_cast %211 : vector<2x8x8xf32> to vector<16x8xf32>
    %214 = arith.truncf %213 : vector<16x8xf32> to vector<16x8xbf16>
    %cst_68 = arith.constant dense<0.000000e+00> : vector<16x32xf32>
    %215 = tpu.matmul %214, %212, %cst_68 {dimension_numbers = #tpu.dot_dimension_numbers<[1], [0], [0], [1], [0, 0, 1, 1], [], []>} : vector<16x8xbf16>, vector<8x32xbf16>, vector<16x32xf32> -> vector<16x32xf32>
    %216 = arith.addf %190, %215 : vector<16x32xf32>
    %217 = vector.extract_strided_slice %161 {offsets = [0, 0, 16], sizes = [2, 8, 8], strides = [1, 1, 1]} : vector<2x8x32xf32> to vector<2x8x8xf32>
    %218 = arith.truncf %217 : vector<2x8x8xf32> to vector<2x8x8xbf16>
    %219 = vector.extract_strided_slice %162 {offsets = [0, 0, 16], sizes = [2, 16, 8], strides = [1, 1, 1]} : vector<2x16x32xf32> to vector<2x16x8xf32>
    %220 = arith.truncf %219 : vector<2x16x8xf32> to vector<2x16x8xbf16>
    %221 = vector.extract_strided_slice %163 {offsets = [0, 0, 16], sizes = [2, 16, 8], strides = [1, 1, 1]} : vector<2x16x32xf32> to vector<2x16x8xf32>
    %222 = arith.truncf %221 : vector<2x16x8xf32> to vector<2x16x8xbf16>
    "tpu.trace_start"() <{level = 10 : i32, message = "bqd,bkd->bqk"}> : () -> ()
    %cst_69 = arith.constant dense<0.000000e+00> : vector<2x8x16xf32>
    %223 = tpu.matmul %218, %220, %cst_69 {dimension_numbers = #tpu.dot_dimension_numbers<[2], [2], [1], [1], [0, 0, 0, 1, 1, 1], [0], [0]>} : vector<2x8x8xbf16>, vector<2x16x8xbf16>, vector<2x8x16xf32> -> vector<2x8x16xf32>
    "tpu.trace_stop"() : () -> ()
    %cst_70 = arith.constant 0.353553385 : f32
    %224 = vector.broadcast %cst_70 : f32 to vector<2x8x16xf32>
    %225 = arith.mulf %223, %224 : vector<2x8x16xf32>
    %cst_71 = arith.constant dense<0xFF800000> : vector<2x8xf32>
    %226 = vector.multi_reduction <maximumf>, %225, %cst_71 [2] : vector<2x8x16xf32> to vector<2x8xf32>
    %227 = vector.shape_cast %226 : vector<2x8xf32> to vector<2x8x1xf32>
    %228 = vector.broadcast %227 : vector<2x8x1xf32> to vector<2x8x16xf32>
    %229 = arith.subf %225, %228 : vector<2x8x16xf32>
    %230 = math.exp %229 : vector<2x8x16xf32>
    %cst_72 = arith.constant dense<0.000000e+00> : vector<2x8xf32>
    %231 = vector.multi_reduction <add>, %230, %cst_72 [2] : vector<2x8x16xf32> to vector<2x8xf32>
    %232 = vector.shape_cast %231 : vector<2x8xf32> to vector<2x8x1xf32>
    %233 = tpu.reciprocal %232 {approx = true} : vector<2x8x1xf32> -> vector<2x8x1xf32>
    %234 = vector.broadcast %233 : vector<2x8x1xf32> to vector<2x8x16xf32>
    %235 = arith.mulf %230, %234 : vector<2x8x16xf32>
    %236 = arith.truncf %235 : vector<2x8x16xf32> to vector<2x8x16xbf16>
    "tpu.trace_start"() <{level = 10 : i32, message = "bqk,bkd->bqd"}> : () -> ()
    %cst_73 = arith.constant dense<0.000000e+00> : vector<2x8x8xf32>
    %237 = tpu.matmul %236, %222, %cst_73 {dimension_numbers = #tpu.dot_dimension_numbers<[2], [1], [1], [2], [0, 0, 0, 1, 1, 2], [0], [0]>} : vector<2x8x16xbf16>, vector<2x16x8xbf16>, vector<2x8x8xf32> -> vector<2x8x8xf32>
    "tpu.trace_stop"() : () -> ()
    %c16_74 = arith.constant 16 : index
    %c32_75 = arith.constant 32 : index
    %238 = vector.load %arg3[%c16_74, %c32_75] : memref<32x64xbf16, #tpu.memory_space<vmem>>, vector<8x32xbf16>
    %239 = vector.shape_cast %237 : vector<2x8x8xf32> to vector<16x8xf32>
    %240 = arith.truncf %239 : vector<16x8xf32> to vector<16x8xbf16>
    %cst_76 = arith.constant dense<0.000000e+00> : vector<16x32xf32>
    %241 = tpu.matmul %240, %238, %cst_76 {dimension_numbers = #tpu.dot_dimension_numbers<[1], [0], [0], [1], [0, 0, 1, 1], [], []>} : vector<16x8xbf16>, vector<8x32xbf16>, vector<16x32xf32> -> vector<16x32xf32>
    %242 = arith.addf %216, %241 : vector<16x32xf32>
    %243 = vector.extract_strided_slice %161 {offsets = [0, 0, 24], sizes = [2, 8, 8], strides = [1, 1, 1]} : vector<2x8x32xf32> to vector<2x8x8xf32>
    %244 = arith.truncf %243 : vector<2x8x8xf32> to vector<2x8x8xbf16>
    %245 = vector.extract_strided_slice %162 {offsets = [0, 0, 24], sizes = [2, 16, 8], strides = [1, 1, 1]} : vector<2x16x32xf32> to vector<2x16x8xf32>
    %246 = arith.truncf %245 : vector<2x16x8xf32> to vector<2x16x8xbf16>
    %247 = vector.extract_strided_slice %163 {offsets = [0, 0, 24], sizes = [2, 16, 8], strides = [1, 1, 1]} : vector<2x16x32xf32> to vector<2x16x8xf32>
    %248 = arith.truncf %247 : vector<2x16x8xf32> to vector<2x16x8xbf16>
    "tpu.trace_start"() <{level = 10 : i32, message = "bqd,bkd->bqk"}> : () -> ()
    %cst_77 = arith.constant dense<0.000000e+00> : vector<2x8x16xf32>
    %249 = tpu.matmul %244, %246, %cst_77 {dimension_numbers = #tpu.dot_dimension_numbers<[2], [2], [1], [1], [0, 0, 0, 1, 1, 1], [0], [0]>} : vector<2x8x8xbf16>, vector<2x16x8xbf16>, vector<2x8x16xf32> -> vector<2x8x16xf32>
    "tpu.trace_stop"() : () -> ()
    %cst_78 = arith.constant 0.353553385 : f32
    %250 = vector.broadcast %cst_78 : f32 to vector<2x8x16xf32>
    %251 = arith.mulf %249, %250 : vector<2x8x16xf32>
    %cst_79 = arith.constant dense<0xFF800000> : vector<2x8xf32>
    %252 = vector.multi_reduction <maximumf>, %251, %cst_79 [2] : vector<2x8x16xf32> to vector<2x8xf32>
    %253 = vector.shape_cast %252 : vector<2x8xf32> to vector<2x8x1xf32>
    %254 = vector.broadcast %253 : vector<2x8x1xf32> to vector<2x8x16xf32>
    %255 = arith.subf %251, %254 : vector<2x8x16xf32>
    %256 = math.exp %255 : vector<2x8x16xf32>
    %cst_80 = arith.constant dense<0.000000e+00> : vector<2x8xf32>
    %257 = vector.multi_reduction <add>, %256, %cst_80 [2] : vector<2x8x16xf32> to vector<2x8xf32>
    %258 = vector.shape_cast %257 : vector<2x8xf32> to vector<2x8x1xf32>
    %259 = tpu.reciprocal %258 {approx = true} : vector<2x8x1xf32> -> vector<2x8x1xf32>
    %260 = vector.broadcast %259 : vector<2x8x1xf32> to vector<2x8x16xf32>
    %261 = arith.mulf %256, %260 : vector<2x8x16xf32>
    %262 = arith.truncf %261 : vector<2x8x16xf32> to vector<2x8x16xbf16>
    "tpu.trace_start"() <{level = 10 : i32, message = "bqk,bkd->bqd"}> : () -> ()
    %cst_81 = arith.constant dense<0.000000e+00> : vector<2x8x8xf32>
    %263 = tpu.matmul %262, %248, %cst_81 {dimension_numbers = #tpu.dot_dimension_numbers<[2], [1], [1], [2], [0, 0, 0, 1, 1, 2], [0], [0]>} : vector<2x8x16xbf16>, vector<2x16x8xbf16>, vector<2x8x8xf32> -> vector<2x8x8xf32>
    "tpu.trace_stop"() : () -> ()
    %c24_82 = arith.constant 24 : index
    %c32_83 = arith.constant 32 : index
    %264 = vector.load %arg3[%c24_82, %c32_83] : memref<32x64xbf16, #tpu.memory_space<vmem>>, vector<8x32xbf16>
    %265 = vector.shape_cast %263 : vector<2x8x8xf32> to vector<16x8xf32>
    %266 = arith.truncf %265 : vector<16x8xf32> to vector<16x8xbf16>
    %cst_84 = arith.constant dense<0.000000e+00> : vector<16x32xf32>
    %267 = tpu.matmul %266, %264, %cst_84 {dimension_numbers = #tpu.dot_dimension_numbers<[1], [0], [0], [1], [0, 0, 1, 1], [], []>} : vector<16x8xbf16>, vector<8x32xbf16>, vector<16x32xf32> -> vector<16x32xf32>
    %268 = arith.addf %242, %267 : vector<16x32xf32>
    %c0_85 = arith.constant 0 : index
    %c288 = arith.constant 288 : index
    %269 = vector.load %arg5[%c0_85, %c288] : memref<1x544xf32, #tpu.memory_space<vmem>>, vector<1x32xf32>
    %270 = vector.broadcast %269 : vector<1x32xf32> to vector<16x32xf32>
    %271 = arith.addf %268, %270 : vector<16x32xf32>
    %272 = arith.addf %146, %271 : vector<16x32xf32>
    %cst_86 = arith.constant dense<0.000000e+00> : vector<16xf32>
    %273 = vector.multi_reduction <add>, %272, %cst_86 [1] : vector<16x32xf32> to vector<16xf32>
    %274 = vector.shape_cast %273 : vector<16xf32> to vector<16x1xf32>
    %cst_87 = arith.constant 3.200000e+01 : f32
    %275 = vector.broadcast %cst_87 : f32 to vector<16x1xf32>
    %276 = arith.divf %274, %275 : vector<16x1xf32>
    %277 = vector.broadcast %276 : vector<16x1xf32> to vector<16x32xf32>
    %278 = arith.subf %272, %277 : vector<16x32xf32>
    %279 = arith.mulf %278, %278 : vector<16x32xf32>
    %cst_88 = arith.constant dense<0.000000e+00> : vector<16xf32>
    %280 = vector.multi_reduction <add>, %279, %cst_88 [1] : vector<16x32xf32> to vector<16xf32>
    %281 = vector.shape_cast %280 : vector<16xf32> to vector<16x1xf32>
    %cst_89 = arith.constant 3.200000e+01 : f32
    %282 = vector.broadcast %cst_89 : f32 to vector<16x1xf32>
    %283 = arith.divf %281, %282 : vector<16x1xf32>
    %284 = vector.broadcast %276 : vector<16x1xf32> to vector<16x32xf32>
    %285 = arith.subf %272, %284 : vector<16x32xf32>
    %cst_90 = arith.constant 9.99999974E-6 : f32
    %286 = vector.broadcast %cst_90 : f32 to vector<16x1xf32>
    %287 = arith.addf %283, %286 : vector<16x1xf32>
    %288 = math.rsqrt %287 : vector<16x1xf32>
    %289 = vector.broadcast %288 : vector<16x1xf32> to vector<16x32xf32>
    %290 = arith.mulf %285, %289 : vector<16x32xf32>
    %c0_91 = arith.constant 0 : index
    %c416 = arith.constant 416 : index
    %291 = vector.load %arg5[%c0_91, %c416] : memref<1x544xf32, #tpu.memory_space<vmem>>, vector<1x32xf32>
    %292 = vector.broadcast %291 : vector<1x32xf32> to vector<16x32xf32>
    %293 = arith.mulf %290, %292 : vector<16x32xf32>
    %c0_92 = arith.constant 0 : index
    %c448 = arith.constant 448 : index
    %294 = vector.load %arg5[%c0_92, %c448] : memref<1x544xf32, #tpu.memory_space<vmem>>, vector<1x32xf32>
    %295 = vector.broadcast %294 : vector<1x32xf32> to vector<16x32xf32>
    %296 = arith.addf %293, %295 : vector<16x32xf32>
    %c0_93 = arith.constant 0 : index
    %c192 = arith.constant 192 : index
    %297 = vector.load %arg2[%c0_93, %c192] : memref<32x256xbf16, #tpu.memory_space<vmem>>, vector<32x64xbf16>
    %298 = arith.truncf %296 : vector<16x32xf32> to vector<16x32xbf16>
    %cst_94 = arith.constant dense<0.000000e+00> : vector<16x64xf32>
    %299 = tpu.matmul %298, %297, %cst_94 {dimension_numbers = #tpu.dot_dimension_numbers<[1], [0], [0], [1], [0, 0, 1, 1], [], []>} : vector<16x32xbf16>, vector<32x64xbf16>, vector<16x64xf32> -> vector<16x64xf32>
    %c0_95 = arith.constant 0 : index
    %c192_96 = arith.constant 192 : index
    %300 = vector.load %arg5[%c0_95, %c192_96] : memref<1x544xf32, #tpu.memory_space<vmem>>, vector<1x64xf32>
    %301 = vector.broadcast %300 : vector<1x64xf32> to vector<16x64xf32>
    %302 = arith.addf %299, %301 : vector<16x64xf32>
    %cst_97 = arith.constant 5.000000e-01 : f32
    %303 = vector.broadcast %cst_97 : f32 to vector<16x64xf32>
    %304 = arith.mulf %303, %302 : vector<16x64xf32>
    %cst_98 = arith.constant 4.471500e-02 : f32
    %305 = vector.broadcast %cst_98 : f32 to vector<16x64xf32>
    %306 = arith.mulf %305, %302 : vector<16x64xf32>
    %307 = arith.mulf %306, %302 : vector<16x64xf32>
    %308 = arith.mulf %307, %302 : vector<16x64xf32>
    %309 = arith.addf %302, %308 : vector<16x64xf32>
    %cst_99 = arith.constant 0.797884583 : f32
    %310 = vector.broadcast %cst_99 : f32 to vector<16x64xf32>
    %311 = arith.mulf %310, %309 : vector<16x64xf32>
    %312 = math.tanh %311 : vector<16x64xf32>
    %cst_100 = arith.constant 1.000000e+00 : f32
    %313 = vector.broadcast %cst_100 : f32 to vector<16x64xf32>
    %314 = arith.addf %313, %312 : vector<16x64xf32>
    %315 = arith.mulf %304, %314 : vector<16x64xf32>
    %c0_101 = arith.constant 0 : index
    %c0_102 = arith.constant 0 : index
    %316 = vector.load %arg4[%c0_101, %c0_102] : memref<64x32xbf16, #tpu.memory_space<vmem>>, vector<64x32xbf16>
    %317 = arith.truncf %315 : vector<16x64xf32> to vector<16x64xbf16>
    %cst_103 = arith.constant dense<0.000000e+00> : vector<16x32xf32>
    %318 = tpu.matmul %317, %316, %cst_103 {dimension_numbers = #tpu.dot_dimension_numbers<[1], [0], [0], [1], [0, 0, 1, 1], [], []>} : vector<16x64xbf16>, vector<64x32xbf16>, vector<16x32xf32> -> vector<16x32xf32>
    %c0_104 = arith.constant 0 : index
    %c320 = arith.constant 320 : index
    %319 = vector.load %arg5[%c0_104, %c320] : memref<1x544xf32, #tpu.memory_space<vmem>>, vector<1x32xf32>
    %320 = vector.broadcast %319 : vector<1x32xf32> to vector<16x32xf32>
    %321 = arith.addf %318, %320 : vector<16x32xf32>
    %322 = arith.addf %296, %321 : vector<16x32xf32>
    %cst_105 = arith.constant dense<0.000000e+00> : vector<16xf32>
    %323 = vector.multi_reduction <add>, %322, %cst_105 [1] : vector<16x32xf32> to vector<16xf32>
    %324 = vector.shape_cast %323 : vector<16xf32> to vector<16x1xf32>
    %cst_106 = arith.constant 3.200000e+01 : f32
    %325 = vector.broadcast %cst_106 : f32 to vector<16x1xf32>
    %326 = arith.divf %324, %325 : vector<16x1xf32>
    %327 = vector.broadcast %326 : vector<16x1xf32> to vector<16x32xf32>
    %328 = arith.subf %322, %327 : vector<16x32xf32>
    %329 = arith.mulf %328, %328 : vector<16x32xf32>
    %cst_107 = arith.constant dense<0.000000e+00> : vector<16xf32>
    %330 = vector.multi_reduction <add>, %329, %cst_107 [1] : vector<16x32xf32> to vector<16xf32>
    %331 = vector.shape_cast %330 : vector<16xf32> to vector<16x1xf32>
    %cst_108 = arith.constant 3.200000e+01 : f32
    %332 = vector.broadcast %cst_108 : f32 to vector<16x1xf32>
    %333 = arith.divf %331, %332 : vector<16x1xf32>
    %334 = vector.broadcast %326 : vector<16x1xf32> to vector<16x32xf32>
    %335 = arith.subf %322, %334 : vector<16x32xf32>
    %cst_109 = arith.constant 9.99999974E-6 : f32
    %336 = vector.broadcast %cst_109 : f32 to vector<16x1xf32>
    %337 = arith.addf %333, %336 : vector<16x1xf32>
    %338 = math.rsqrt %337 : vector<16x1xf32>
    %339 = vector.broadcast %338 : vector<16x1xf32> to vector<16x32xf32>
    %340 = arith.mulf %335, %339 : vector<16x32xf32>
    %c0_110 = arith.constant 0 : index
    %c480 = arith.constant 480 : index
    %341 = vector.load %arg5[%c0_110, %c480] : memref<1x544xf32, #tpu.memory_space<vmem>>, vector<1x32xf32>
    %342 = vector.broadcast %341 : vector<1x32xf32> to vector<16x32xf32>
    %343 = arith.mulf %340, %342 : vector<16x32xf32>
    %c0_111 = arith.constant 0 : index
    %c512 = arith.constant 512 : index
    %344 = vector.load %arg5[%c0_111, %c512] : memref<1x544xf32, #tpu.memory_space<vmem>>, vector<1x32xf32>
    %345 = vector.broadcast %344 : vector<1x32xf32> to vector<16x32xf32>
    %346 = arith.addf %343, %345 : vector<16x32xf32>
    %c0_112 = arith.constant 0 : index
    %c0_113 = arith.constant 0 : index
    %347 = vector.load %arg6[%c0_112, %c0_113] : memref<16x32xf32, #tpu.memory_space<vmem>>, vector<16x32xf32>
    tpu.vector_store %arg6[%c0_112, %c0_113], %346 {strides = array<i32>} : memref<16x32xf32, #tpu.memory_space<vmem>>, vector<16x32xf32>,
    return
  }
}

</mosaic_0001>

<bundles_post_ra>
// kernel: transformer_decoder_layer.1
= control target key start
LH: loop header
LB: loop body
LE: loop exit
PB: predicated region body
PF: predicated region fallthrough
CT: control target
= control target key end

     0   :  { %v3328_v0 = vmov 0.0   ;;  %vm3329_vm0 = vmmov 0   ;;  %vm54_vm1 = vcmask 261120   ;;  %vm104_vm2 = vcmask 64512   ;;  %s3331_s7 = smov 64   ;;  %s3332_s8 = smov 88   ;;  %s3931_s2 = inlined_call_operand.vmem [shape: bf16[32,256], index: 2, kind: input, shape index: {}]   ;;  %s3932_s0 = inlined_call_operand.vmem [shape: f32[16,32], index: 0, kind: input, shape index: {}]   ;;  %s3933_s5 = inlined_call_operand.vmem [shape: f32[1,544], index: 5, kind: input, shape index: {}]   ;;  %s3934_s3 = inlined_call_operand.vmem [shape: bf16[32,64], index: 3, kind: input, shape index: {}]   ;;  %s3935_s1 = inlined_call_operand.vmem [shape: f32[32,32], index: 1, kind: input, shape index: {}]   ;;  %s3936_s4 = inlined_call_operand.vmem [shape: bf16[64,32], index: 4, kind: input, shape index: {}]   ;;  %s3937_s6 = inlined_call_operand.vmem [shape: f32[16,32], index: 6, kind: output, shape index: {}]  }
   0x1   :  { %2933 = vmatprep.subr.bf16.mxu1 %v3328_v0  ;;  %v3231_v1 = vld [vmem:[%s3931_s2] ss:$8 sps:$4 sm:$0xff]   ;;  %2937 = vmatprep.mubr.msk.bf16.mxu1 %vm3329_vm0, %v3328_v0  ;;  %v3232_v2 = vld [vmem:[%s3931_s2 + $0x10] ss:$8 sps:$4 sm:$0xff]   ;;  %vm231_vm3 = vcmask 1043456   ;;  %s3333_s9 = smov 120  }
   0x2   :  { %2947 = vmatprep.subr.bf16.mxu0 %v3328_v0  ;;  %2949 = vmatprep.mubr.msk.bf16.mxu0 %vm3329_vm0, %v3328_v0  ;;  %v3392_v3 = vld [vmem:[%s3932_s0] sm:$0xff]  ;;  %v3397_v4 = vld [vmem:[%s3932_s0 + $0x8] sm:$0xff]  ;;  %s3330_s0 = smov 96   ;;  %s3334_s10 = smov 56   ;;  %vm1493_vm4 = vcmask 130048   ;;  %vm2671_vm5 = vcmask 523264  }
   0x3   :  { %2934 = vmatpush3.bf16.msra.mxu1 %v3231_v1  ;;  %v34_v5 = vpack.c.bf16 %v3397_v4, %v3392_v3  ;;  %v3409_v6 = vld [vmem:[%s3933_s5] ss:$0 sm:$0xff]  ;;  %s3335_s11 = smov 112   ;;  %s3336_s12 = smov 80  }
   0x4   :  { %2935 = vmatprep.subr.bf16.mxu1 %v3328_v0  ;;  %s3337_s17 = smov 48   ;;  %s3338_s18 = smov 72  }
   0x5   :  { %s3339_s19 = smov 104   ;;  %s3340_s22 = smov 40  }
   0x6   :  { %s3341_s29 = smov 32  }
   0x7   :  { %2936 = vmatpush3.bf16.msra.mxu1 %v3232_v2 }
   0x8   :  { %2941 = vmatprep.subr.bf16.mxu1 %v3328_v0 }
   0xa   :  { %2938 = vmatmul.mubr.msk.bf16.vlgmr.msra.gmra.mrb[0].mxu1 %vm54_vm1, %v34_v5 }
   0xb   :  { %2943 = vmatprep.mubr.msk.bf16.mxu1 %vm3329_vm0, %v3328_v0 }
  0xdd   :  { %v92_v7 = vpop.f32.mrb[0].mxu1 }
  0xde   :  { %v93_v8 = vadd.f32 %v3409_v6, %v92_v7  ;;  %v2939_v9 = vpop.f32.mrb[1].mxu1 }
  0xdf   :  { %v95_v10 = vpop.f32.mrb[2].mxu1 }
  0xe0   :  { %v3412_v11 = vpack.c.bf16 %v93_v8, %v93_v8  ;;  %v96_v12 = vadd.f32 %v3409_v6, %v95_v10  ;;  %v2940_v13 = vpop.f32.mrb[3].mxu1 }
  0xe2   :  { %102 = vrot.lane.b32.xlu0 %v3412_v11, %s3330_s0  ;;  %v3417_v14 = vpack.c.bf16 %v96_v12, %v96_v12 }
  0xe6   :  { %152 = vrot.lane.b32.xlu0 %v3417_v14, %s3330_s0 }
 0x154   :  { %v103_v15 = vpop.permute.xlu0 %102 }
 0x155   :  { %v109_v16 = vsel %vm104_vm2, %v103_v15, 0 }
 0x156   :  { %2942 = vmatpush3.bf16.xpose.msra.mxu1 %v109_v16 }
 0x157   :  { %2953 = vmatprep.subr.bf16.mxu1 %v3328_v0 }
 0x158   :  { %v153_v17 = vpop.permute.xlu0 %152 }
 0x159   :  { %v158_v18 = vsel %vm104_vm2, %v153_v17, 0 }
 0x15a   :  { %2948 = vmatpush3.bf16.xpose.msra.mxu0 %v158_v18 }
 0x15b   :  { %2959 = vmatprep.subr.bf16.mxu0 %v3328_v0 }
 0x15d   :  { %2944 = vmatmul.mubr.msk.bf16.vlgmr.msra.gmra.mrb[4].mxu1 %vm104_vm2, %v3412_v11 }
 0x15e   :  { %2955 = vmatprep.mubr.msk.bf16.mxu1 %vm3329_vm0, %v3328_v0 }
 0x161   :  { %2950 = vmatmul.mubr.msk.bf16.vlgmr.msra.gmra.mrb[0].mxu0 %vm104_vm2, %v3417_v14 }
 0x162   :  { %2961 = vmatprep.mubr.msk.bf16.mxu0 %vm3329_vm0, %v3328_v0 }
 0x230   :  { %v145_v19 = vpop.f32.mrb[4].mxu1 }
 0x231   :  { %v200_v20 = vmul.f32 0.35355338, %v145_v19  ;;  %v2945_v21 = vpop.f32.mrb[5].mxu1 }
 0x232   :  { %v148_v22 = vpop.f32.mrb[6].mxu1 }
 0x233   :  { %v2946_v23 = vpop.f32.mrb[7].mxu1  ;;  %v202_v24 = vsel %vm104_vm2, %v200_v20, -inf }
 0x234   :  { %v194_v25 = vpop.f32.mrb[0].mxu0  ;;  %203 = vmax.xlane.f32.xlu1 %v202_v24 }
 0x235   :  { %v201_v26 = vmul.f32 0.35355338, %v194_v25  ;;  %v2951_v27 = vpop.f32.mrb[1].mxu0 }
 0x236   :  { %v197_v28 = vpop.f32.mrb[2].mxu0 }
 0x237   :  { %v2952_v29 = vpop.f32.mrb[3].mxu0  ;;  %v205_v30 = vsel %vm104_vm2, %v201_v26, -inf }
 0x238   :  { %206 = vmax.xlane.f32.xlu1 %v205_v30 }
 0x249   :  { %226 = vrot.lane.b32.xlu1 %v3412_v11, %s3331_s7 }
 0x24d   :  { %275 = vrot.lane.b32.xlu1 %v3417_v14, %s3331_s7 }
 0x251   :  { %327 = vrot.lane.b32.xlu1 %v3412_v11, %s3332_s8 }
 0x2c1   :  { %v204_v31 = vpop.xlane.xlu1 %203 }
 0x2c2   :  { %v208_v32 = vsub.f32 %v200_v20, %v204_v31 }
 0x2c4   :  { %v210_v33 = vmul.f32 1.442695, %v208_v32 }
 0x2c5   :  { %v207_v34 = vpop.xlane.xlu1 %206 }
 0x2c6   :  { %3247 = vpow2.f32 %v210_v33  ;;  %v209_v35 = vsub.f32 %v201_v26, %v207_v34 }
 0x2c8   :  { %v212_v36 = vmul.f32 1.442695, %v209_v35 }
 0x2c9   :  { %v227_v37 = vpop.permute.xlu1 %226 }
 0x2ca   :  { %3249 = vpow2.f32 %v212_v36  ;;  %v233_v38 = vsel %vm231_vm3, %v227_v37, 0 }
 0x2cb   :  { %2954 = vmatpush3.bf16.msra.mxu1 %v233_v38 }
 0x2cc   :  { %2965 = vmatprep.subr.bf16.mxu1 %v3328_v0 }
 0x2cd   :  { %v276_v39 = vpop.permute.xlu1 %275 }
 0x2ce   :  { %v281_v40 = vsel %vm231_vm3, %v276_v39, 0  ;;  %v547_v39 = vld [vmem:[%s3934_s3 + $0x4] sm:$0xf] }
 0x2cf   :  { %2960 = vmatpush3.bf16.msra.mxu0 %v281_v40 }
 0x2d0   :  { %v3248_v41 = vpop.eup %3247  ;;  %2971 = vmatprep.subr.bf16.mxu0 %v3328_v0 }
 0x2d1   :  { %v214_v42 = vsel %vm104_vm2, %v3248_v41, 0.0  ;;  %v328_v45 = vpop.permute.xlu1 %327 }
 0x2d2   :  { %215 = vadd.xlane.f32.xlu0 %v214_v42  ;;  %v333_v52 = vsel %vm104_vm2, %v328_v45, 0  ;;  %v553_v42 = vsel %vm231_vm3, %v547_v39, 0 }
 0x2d4   :  { %v3250_v43 = vpop.eup %3249 }
 0x2d5   :  { %v217_v44 = vsel %vm104_vm2, %v3250_v43, 0.0 }
 0x2d6   :  { %218 = vadd.xlane.f32.xlu1 %v217_v44  ;;  %v323_v44 = vld [vmem:[%s3934_s3] sm:$0xf] }
 0x2e7   :  { %377 = vrot.lane.b32.xlu1 %v3417_v14, %s3332_s8 }
 0x2e8   :  { %325 = vrot.lane.b32.xlu0 %v3412_v11, %s3333_s9 }
 0x2eb   :  { %375 = vrot.lane.b32.xlu1 %v3417_v14, %s3333_s9 }
 0x35f   :  { %v216_v46 = vpop.xlane.xlu0 %215 }
 0x360   :  { %3251 = vrcp.f32 %v216_v46 }
 0x363   :  { %v219_v47 = vpop.xlane.xlu1 %218  ;;  %v326_v57 = vpop.permute.xlu0 %325 }
 0x364   :  { %3253 = vrcp.f32 %v219_v47  ;;  %v600_v47 = vsel %vm231_vm3, %v323_v44, 0 }
 0x367   :  { %v378_v54 = vpop.permute.xlu1 %377 }
 0x368   :  { %v383_v56 = vsel %vm104_vm2, %v378_v54, 0 }
 0x36a   :  { %v3252_v48 = vpop.eup %3251 }
 0x36b   :  { %v222_v49 = vmul.f32 %v3252_v48, %v3248_v41  ;;  %v376_v58 = vpop.permute.xlu1 %375 }
 0x36d   :  { %v224_v50 = vpack.c.bf16 %v222_v49, %v222_v49 }
 0x36e   :  { %v3254_v51 = vpop.eup %3253 }
 0x36f   :  { %v223_v53 = vmul.f32 %v3254_v51, %v3250_v43  ;;  %2956 = vmatmul.mubr.msk.bf16.vlgmr.msra.gmra.mrb[8].mxu1 %vm104_vm2, %v224_v50 }
 0x370   :  { %2966 = vmatpush3.bf16.xpose.msra.mxu1 %v333_v52  ;;  %2967 = vmatprep.mubr.msk.bf16.mxu1 %vm3329_vm0, %v3328_v0 }
 0x371   :  { %v225_v55 = vpack.c.bf16 %v223_v53, %v223_v53  ;;  %2977 = vmatprep.subr.bf16.mxu1 %v3328_v0 }
 0x373   :  { %2962 = vmatmul.mubr.msk.bf16.vlgmr.msra.gmra.mrb[4].mxu0 %vm104_vm2, %v225_v55 }
 0x374   :  { %2972 = vmatpush3.bf16.xpose.msra.mxu0 %v383_v56  ;;  %2973 = vmatprep.mubr.msk.bf16.mxu0 %vm3329_vm0, %v3328_v0 }
 0x375   :  { %2983 = vmatprep.subr.bf16.mxu0 %v3328_v0 }
 0x377   :  { %2968 = vmatmul.mubr.msk.bf16.vlgmr.msra.gmra.mrb[12].mxu1 %vm104_vm2, %v326_v57 }
 0x378   :  { %2979 = vmatprep.mubr.msk.bf16.mxu1 %vm3329_vm0, %v3328_v0 }
 0x37b   :  { %2974 = vmatmul.mubr.msk.bf16.vlgmr.msra.gmra.mrb[8].mxu0 %vm104_vm2, %v376_v58 }
 0x37c   :  { %2985 = vmatprep.mubr.msk.bf16.mxu0 %vm3329_vm0, %v3328_v0 }
 0x442   :  { %v3469_v59 = vpop.f32.mrb[8].mxu1 }
 0x443   :  { %v2957_v60 = vpop.f32.mrb[9].mxu1 }
 0x444   :  { %v272_v61 = vpop.f32.mrb[10].mxu1 }
 0x445   :  { %v2958_v62 = vpop.f32.mrb[11].mxu1 }
 0x446   :  { %v3471_v63 = vpop.f32.mrb[4].mxu0 }
 0x447   :  { %v324_v1 = vpack.c.bf16 %v3471_v63, %v3469_v59  ;;  %v2963_v2 = vpop.f32.mrb[5].mxu0 }
 0x448   :  { %v320_v5 = vpop.f32.mrb[6].mxu0 }
 0x449   :  { %v2964_v7 = vpop.f32.mrb[7].mxu0 }
 0x44a   :  { %v369_v8 = vpop.f32.mrb[12].mxu1 }
 0x44b   :  { %v425_v9 = vmul.f32 0.35355338, %v369_v8  ;;  %v2969_v10 = vpop.f32.mrb[13].mxu1 }
 0x44c   :  { %v372_v12 = vpop.f32.mrb[14].mxu1 }
 0x44d   :  { %v2970_v13 = vpop.f32.mrb[15].mxu1  ;;  %v427_v15 = vsel %vm104_vm2, %v425_v9, -inf }
 0x44e   :  { %v419_v16 = vpop.f32.mrb[8].mxu0  ;;  %428 = vmax.xlane.f32.xlu1 %v427_v15 }
 0x44f   :  { %v426_v17 = vmul.f32 0.35355338, %v419_v16  ;;  %v2975_v18 = vpop.f32.mrb[9].mxu0 }
 0x450   :  { %v422_v19 = vpop.f32.mrb[10].mxu0 }
 0x451   :  { %v2976_v20 = vpop.f32.mrb[11].mxu0  ;;  %v430_v21 = vsel %vm104_vm2, %v426_v17, -inf }
 0x452   :  { %431 = vmax.xlane.f32.xlu0 %v430_v21 }
 0x468   :  { %499 = vrot.lane.b32.xlu0 %v3417_v14, %s3334_s10 }
 0x46c   :  { %643 = vrot.lane.b32.xlu0 %v3412_v11, %s3335_s11 }
 0x4db   :  { %v429_v22 = vpop.xlane.xlu1 %428 }
 0x4dc   :  { %v433_v23 = vsub.f32 %v425_v9, %v429_v22 }
 0x4de   :  { %v435_v24 = vmul.f32 1.442695, %v433_v23 }
 0x4df   :  { %v432_v25 = vpop.xlane.xlu0 %431 }
 0x4e0   :  { %3255 = vpow2.f32 %v435_v24  ;;  %v434_v26 = vsub.f32 %v426_v17, %v432_v25 }
 0x4e2   :  { %v437_v27 = vmul.f32 1.442695, %v434_v26 }
 0x4e3   :  { %v500_v28 = vpop.permute.xlu0 %499 }
 0x4e4   :  { %3257 = vpow2.f32 %v437_v27  ;;  %v505_v29 = vsel %vm231_vm3, %v500_v28, 0 }
 0x4e5   :  { %2984 = vmatpush3.bf16.msra.mxu0 %v505_v29 }
 0x4e6   :  { %2995 = vmatprep.subr.bf16.mxu0 %v3328_v0 }
 0x4ea   :  { %v3256_v30 = vpop.eup %3255 }
 0x4eb   :  { %v439_v31 = vsel %vm104_vm2, %v3256_v30, 0.0 }
 0x4ec   :  { %440 = vadd.xlane.f32.xlu1 %v439_v31 }
 0x4ee   :  { %v3258_v32 = vpop.eup %3257 }
 0x4ef   :  { %v442_v33 = vsel %vm104_vm2, %v3258_v32, 0.0 }
 0x4f0   :  { %443 = vadd.xlane.f32.xlu1 %v442_v33 }
 0x501   :  { %451 = vrot.lane.b32.xlu1 %v3412_v11, %s3334_s10 }
 0x505   :  { %645 = vrot.lane.b32.xlu1 %v3412_v11, %s3336_s12 }
 0x509   :  { %695 = vrot.lane.b32.xlu1 %v3417_v14, %s3336_s12 }
 0x50d   :  { %693 = vrot.lane.b32.xlu1 %v3417_v14, %s3335_s11 }
 0x579   :  { %v441_v34 = vpop.xlane.xlu1 %440 }
 0x57a   :  { %3259 = vrcp.f32 %v441_v34 }
 0x57d   :  { %v444_v35 = vpop.xlane.xlu1 %443 }
 0x57e   :  { %3261 = vrcp.f32 %v444_v35 }
 0x581   :  { %v452_v36 = vpop.permute.xlu1 %451 }
 0x582   :  { %v457_v37 = vsel %vm231_vm3, %v452_v36, 0 }
 0x583   :  { %2978 = vmatpush3.bf16.msra.mxu1 %v457_v37 }
 0x584   :  { %v3260_v38 = vpop.eup %3259  ;;  %2989 = vmatprep.subr.bf16.mxu1 %v3328_v0 }
 0x585   :  { %v447_v40 = vmul.f32 %v3260_v38, %v3256_v30  ;;  %v646_v48 = vpop.permute.xlu1 %645 }
 0x586   :  { %v651_v60 = vsel %vm104_vm2, %v646_v48, 0 }
 0x587   :  { %v449_v41 = vpack.c.bf16 %v447_v40, %v447_v40 }
 0x588   :  { %v3262_v43 = vpop.eup %3261 }
 0x589   :  { %v448_v45 = vmul.f32 %v3262_v43, %v3258_v32  ;;  %2980 = vmatmul.mubr.msk.bf16.vlgmr.msra.gmra.mrb[16].mxu1 %vm104_vm2, %v449_v41  ;;  %v696_v49 = vpop.permute.xlu1 %695 }
 0x58a   :  { %2990 = vmatpush3.bf16.msra.mxu1 %v553_v42  ;;  %2991 = vmatprep.mubr.msk.bf16.mxu1 %vm3329_vm0, %v3328_v0  ;;  %v701_v50 = vsel %vm104_vm2, %v696_v49, 0 }
 0x58b   :  { %v450_v46 = vpack.c.bf16 %v448_v45, %v448_v45  ;;  %3001 = vmatprep.subr.bf16.mxu1 %v3328_v0 }
 0x58d   :  { %2986 = vmatmul.mubr.msk.bf16.vlgmr.msra.gmra.mrb[12].mxu0 %vm104_vm2, %v450_v46  ;;  %v694_v51 = vpop.permute.xlu1 %693 }
 0x58e   :  { %2996 = vmatpush3.bf16.msra.mxu0 %v600_v47  ;;  %2997 = vmatprep.mubr.msk.bf16.mxu0 %vm3329_vm0, %v3328_v0 }
 0x58f   :  { %3007 = vmatprep.subr.bf16.mxu0 %v3328_v0 }
 0x595   :  { %2998 = vmatmul.mubr.msk.bf16.vlgmr.msra.gmra.mrb[16].mxu0 %vm104_vm2, %v324_v1  ;;  %v644_v1 = vpop.permute.xlu0 %643 }
 0x596   :  { %3009 = vmatprep.mubr.msk.bf16.mxu0 %vm3329_vm0, %v3328_v0 }
 0x597   :  { %3008 = vmatpush3.bf16.xpose.msra.mxu0 %v701_v50 }
 0x598   :  { %3019 = vmatprep.subr.bf16.mxu0 %v3328_v0 }
 0x59e   :  { %3010 = vmatmul.mubr.msk.bf16.vlgmr.msra.gmra.mrb[20].mxu0 %vm104_vm2, %v694_v51 }
 0x59f   :  { %3021 = vmatprep.mubr.msk.bf16.mxu0 %vm3329_vm0, %v3328_v0 }
 0x65c   :  { %v493_v52 = vpop.f32.mrb[16].mxu1 }
 0x65d   :  { %v2981_v53 = vpop.f32.mrb[17].mxu1 }
 0x65e   :  { %v496_v54 = vpop.f32.mrb[18].mxu1 }
 0x65f   :  { %v2982_v55 = vpop.f32.mrb[19].mxu1 }
 0x660   :  { %v541_v56 = vpop.f32.mrb[12].mxu0 }
 0x661   :  { %v548_v57 = vpack.c.bf16 %v541_v56, %v493_v52  ;;  %v2987_v58 = vpop.f32.mrb[13].mxu0  ;;  %v865_v52 = vld [vmem:[%s3934_s3 + $0x8] sm:$0xf] }
 0x662   :  { %v544_v59 = vpop.f32.mrb[14].mxu0  ;;  %v871_v53 = vsel %vm231_vm3, %v865_v52, 0 }
 0x663   :  { %v2988_v61 = vpop.f32.mrb[15].mxu0  ;;  %2992 = vmatmul.mubr.msk.bf16.vlgmr.msra.gmra.mrb[20].mxu1 %vm104_vm2, %v548_v57 }
 0x664   :  { %3002 = vmatpush3.bf16.xpose.msra.mxu1 %v651_v60  ;;  %3003 = vmatprep.mubr.msk.bf16.mxu1 %vm3329_vm0, %v3328_v0 }
 0x665   :  { %3013 = vmatprep.subr.bf16.mxu1 %v3328_v0 }
 0x668   :  { %v636_v62 = vpop.f32.mrb[16].mxu0 }
 0x669   :  { %v2999_v63 = vpop.f32.mrb[17].mxu0 }
 0x66a   :  { %v639_v2 = vpop.f32.mrb[18].mxu0 }
 0x66b   :  { %v3000_v5 = vpop.f32.mrb[19].mxu0  ;;  %3004 = vmatmul.mubr.msk.bf16.vlgmr.msra.gmra.mrb[24].mxu1 %vm104_vm2, %v644_v1 }
 0x66c   :  { %3015 = vmatprep.mubr.msk.bf16.mxu1 %vm3329_vm0, %v3328_v0 }
 0x671   :  { %v737_v7 = vpop.f32.mrb[20].mxu0 }
 0x672   :  { %v744_v8 = vmul.f32 0.35355338, %v737_v7  ;;  %v3011_v9 = vpop.f32.mrb[21].mxu0 }
 0x673   :  { %v740_v10 = vpop.f32.mrb[22].mxu0 }
 0x674   :  { %v3012_v12 = vpop.f32.mrb[23].mxu0  ;;  %v748_v13 = vsel %vm104_vm2, %v744_v8, -inf }
 0x675   :  { %749 = vmax.xlane.f32.xlu1 %v748_v13 }
 0x686   :  { %769 = vrot.lane.b32.xlu1 %v3412_v11, %s3337_s17 }
 0x68a   :  { %918 = vrot.lane.b32.xlu1 %v3412_v11, %s3338_s18 }
 0x68e   :  { %968 = vrot.lane.b32.xlu1 %v3417_v14, %s3338_s18 }
 0x692   :  { %966 = vrot.lane.b32.xlu1 %v3417_v14, %s3339_s19 }
 0x702   :  { %v750_v15 = vpop.xlane.xlu1 %749 }
 0x703   :  { %v752_v18 = vsub.f32 %v744_v8, %v750_v15 }
 0x705   :  { %v755_v19 = vmul.f32 1.442695, %v752_v18 }
 0x706   :  { %v770_v16 = vpop.permute.xlu1 %769 }
 0x707   :  { %v775_v17 = vsel %vm231_vm3, %v770_v16, 0  ;;  %3263 = vpow2.f32 %v755_v19 }
 0x708   :  { %3014 = vmatpush3.bf16.msra.mxu1 %v775_v17 }
 0x709   :  { %3025 = vmatprep.subr.bf16.mxu1 %v3328_v0 }
 0x70a   :  { %v919_v47 = vpop.permute.xlu1 %918 }
 0x70b   :  { %v924_v49 = vsel %vm104_vm2, %v919_v47, 0 }
 0x70e   :  { %v969_v58 = vpop.permute.xlu1 %968 }
 0x70f   :  { %v974_v63 = vsel %vm104_vm2, %v969_v58, 0  ;;  %v3602_v58 = vld [vmem:[%s3933_s5 + $0x2] ss:$0 sm:$0xff] }
 0x711   :  { %v3264_v32 = vpop.eup %3263 }
 0x712   :  { %v760_v33 = vsel %vm104_vm2, %v3264_v32, 0.0  ;;  %v967_v12 = vpop.permute.xlu1 %966 }
 0x736   :  { %v589_v20 = vpop.f32.mrb[20].mxu1 }
 0x737   :  { %v3539_v21 = vadd.f32 %v636_v62, %v589_v20  ;;  %v2993_v22 = vpop.f32.mrb[21].mxu1 }
 0x738   :  { %v592_v23 = vpop.f32.mrb[22].mxu1 }
 0x739   :  { %v3541_v24 = vadd.f32 %v639_v2, %v592_v23  ;;  %v2994_v25 = vpop.f32.mrb[23].mxu1 }
 0x73e   :  { %v687_v26 = vpop.f32.mrb[24].mxu1 }
 0x73f   :  { %v743_v27 = vmul.f32 0.35355338, %v687_v26  ;;  %v3005_v28 = vpop.f32.mrb[25].mxu1 }
 0x740   :  { %v690_v29 = vpop.f32.mrb[26].mxu1 }
 0x741   :  { %v3006_v30 = vpop.f32.mrb[27].mxu1  ;;  %v745_v31 = vsel %vm104_vm2, %v743_v27, -inf }
 0x742   :  { %746 = vmax.xlane.f32.xlu0 %v745_v31 }
 0x746   :  { %761 = vadd.xlane.f32.xlu0 %v760_v33 }
 0x7cf   :  { %v747_v34 = vpop.xlane.xlu0 %746 }
 0x7d0   :  { %v751_v35 = vsub.f32 %v743_v27, %v747_v34 }
 0x7d2   :  { %v753_v36 = vmul.f32 1.442695, %v751_v35 }
 0x7d3   :  { %v762_v39 = vpop.xlane.xlu0 %761 }
 0x7d4   :  { %3265 = vpow2.f32 %v753_v36 }
 0x7d5   :  { %3267 = vrcp.f32 %v762_v39 }
 0x7de   :  { %v3266_v37 = vpop.eup %3265 }
 0x7df   :  { %v757_v38 = vsel %vm104_vm2, %v3266_v37, 0.0  ;;  %v3268_v40 = vpop.eup %3267 }
 0x7e0   :  { %758 = vadd.xlane.f32.xlu0 %v757_v38  ;;  %v766_v42 = vmul.f32 %v3268_v40, %v3264_v32 }
 0x7e2   :  { %v768_v45 = vpack.c.bf16 %v766_v42, %v766_v42 }
 0x7f6   :  { %817 = vrot.lane.b32.xlu0 %v3417_v14, %s3337_s17 }
 0x7fa   :  { %916 = vrot.lane.b32.xlu0 %v3412_v11, %s3339_s19 }
 0x86d   :  { %v759_v41 = vpop.xlane.xlu0 %758 }
 0x86e   :  { %3269 = vrcp.f32 %v759_v41  ;;  %v1138_v41 = vld [vmem:[%s3934_s3 + $0xc] sm:$0xf] }
 0x86f   :  { %v1144_v42 = vsel %vm231_vm3, %v1138_v41, 0 }
 0x871   :  { %v818_v43 = vpop.permute.xlu0 %817 }
 0x872   :  { %v823_v44 = vsel %vm231_vm3, %v818_v43, 0 }
 0x873   :  { %3020 = vmatpush3.bf16.msra.mxu0 %v823_v44 }
 0x874   :  { %3031 = vmatprep.subr.bf16.mxu0 %v3328_v0 }
 0x875   :  { %v917_v51 = vpop.permute.xlu0 %916 }
 0x876   :  { %3022 = vmatmul.mubr.msk.bf16.vlgmr.msra.gmra.mrb[24].mxu0 %vm104_vm2, %v768_v45 }
 0x877   :  { %3033 = vmatprep.mubr.msk.bf16.mxu0 %vm3329_vm0, %v3328_v0 }
 0x878   :  { %v3270_v46 = vpop.eup %3269 }
 0x879   :  { %v765_v48 = vmul.f32 %v3270_v46, %v3266_v37 }
 0x87b   :  { %v767_v50 = vpack.c.bf16 %v765_v48, %v765_v48 }
 0x87c   :  { %3032 = vmatpush3.bf16.xpose.msra.mxu0 %v924_v49 }
 0x87d   :  { %3016 = vmatmul.mubr.msk.bf16.vlgmr.msra.gmra.mrb[28].mxu1 %vm104_vm2, %v767_v50  ;;  %3043 = vmatprep.subr.bf16.mxu0 %v3328_v0 }
 0x87e   :  { %3027 = vmatprep.mubr.msk.bf16.mxu1 %vm3329_vm0, %v3328_v0  ;;  %3026 = vmatpush3.bf16.msra.mxu1 %v871_v53 }
 0x87f   :  { %3037 = vmatprep.subr.bf16.mxu1 %v3328_v0 }
 0x883   :  { %3034 = vmatmul.mubr.msk.bf16.vlgmr.msra.gmra.mrb[28].mxu0 %vm104_vm2, %v917_v51 }
 0x884   :  { %3045 = vmatprep.mubr.msk.bf16.mxu0 %vm3329_vm0, %v3328_v0 }
 0x949   :  { %v859_v54 = vpop.f32.mrb[24].mxu0 }
 0x94a   :  { %v3023_v55 = vpop.f32.mrb[25].mxu0 }
 0x94b   :  { %v862_v56 = vpop.f32.mrb[26].mxu0 }
 0x94c   :  { %v3024_v57 = vpop.f32.mrb[27].mxu0 }
 0x950   :  { %v811_v59 = vpop.f32.mrb[28].mxu1 }
 0x951   :  { %v866_v60 = vpack.c.bf16 %v859_v54, %v811_v59  ;;  %v3017_v61 = vpop.f32.mrb[29].mxu1 }
 0x952   :  { %v814_v62 = vpop.f32.mrb[30].mxu1 }
 0x953   :  { %v3018_v1 = vpop.f32.mrb[31].mxu1  ;;  %3028 = vmatmul.mubr.msk.bf16.vlgmr.msra.gmra.mrb[32].mxu1 %vm104_vm2, %v866_v60 }
 0x954   :  { %3038 = vmatpush3.bf16.xpose.msra.mxu1 %v974_v63  ;;  %3039 = vmatprep.mubr.msk.bf16.mxu1 %vm3329_vm0, %v3328_v0 }
 0x955   :  { %3049 = vmatprep.subr.bf16.mxu1 %v3328_v0 }
 0x956   :  { %v960_v2 = vpop.f32.mrb[28].mxu0 }
 0x957   :  { %v1016_v5 = vmul.f32 0.35355338, %v960_v2  ;;  %v3035_v7 = vpop.f32.mrb[29].mxu0 }
 0x958   :  { %v963_v8 = vpop.f32.mrb[30].mxu0 }
 0x959   :  { %v3036_v9 = vpop.f32.mrb[31].mxu0  ;;  %v1018_v10 = vsel %vm104_vm2, %v1016_v5, -inf }
 0x95a   :  { %1019 = vmax.xlane.f32.xlu0 %v1018_v10  ;;  %v3233_v10 = vld [vmem:[%s3931_s2] ss:$8 sps:$4 sm:$0xff]  }
 0x95b   :  { %3040 = vmatmul.mubr.msk.bf16.vlgmr.msra.gmra.mrb[36].mxu1 %vm104_vm2, %v967_v12 }
 0x95c   :  { %3051 = vmatprep.mubr.msk.bf16.mxu1 %vm3329_vm0, %v3328_v0 }
 0x9e7   :  { %v1020_v13 = vpop.xlane.xlu0 %1019 }
 0x9e8   :  { %v1024_v15 = vsub.f32 %v1016_v5, %v1020_v13 }
 0x9ea   :  { %v1026_v16 = vmul.f32 1.442695, %v1024_v15 }
 0x9ec   :  { %3271 = vpow2.f32 %v1026_v16 }
 0x9f6   :  { %v3272_v17 = vpop.eup %3271 }
 0x9f7   :  { %v1030_v18 = vsel %vm104_vm2, %v3272_v17, 0.0 }
 0x9f8   :  { %1031 = vadd.xlane.f32.xlu0 %v1030_v18 }
 0xa26   :  { %v907_v19 = vpop.f32.mrb[32].mxu1 }
 0xa27   :  { %v914_v20 = vadd.f32 %v907_v19, %v3539_v21  ;;  %v3029_v22 = vpop.f32.mrb[33].mxu1 }
 0xa28   :  { %v910_v23 = vpop.f32.mrb[34].mxu1 }
 0xa29   :  { %v915_v25 = vadd.f32 %v910_v23, %v3541_v24  ;;  %v3030_v26 = vpop.f32.mrb[35].mxu1  ;;  %v3234_v23 = vld [vmem:[%s3931_s2 + $0x10] ss:$8 sps:$4 sm:$0xff]  }
 0xa2a   :  { %v3236_v26 = vld [vmem:[%s3931_s2 + $0x14] ss:$8 sps:$4 sm:$0xff]  }
 0xa2e   :  { %v1010_v27 = vpop.f32.mrb[36].mxu1 }
 0xa2f   :  { %v1017_v28 = vmul.f32 0.35355338, %v1010_v27  ;;  %v3041_v29 = vpop.f32.mrb[37].mxu1  ;;  %v26_v27 = vld [vmem:[%s3935_s1] sm:$0xff] }
 0xa30   :  { %v1013_v30 = vpop.f32.mrb[38].mxu1  ;;  %v28_v29 = vld [vmem:[%s3935_s1 + $0x10] sm:$0xff] }
 0xa31   :  { %v3042_v31 = vpop.f32.mrb[39].mxu1  ;;  %v1021_v32 = vsel %vm104_vm2, %v1017_v28, -inf }
 0xa32   :  { %1022 = vmax.xlane.f32.xlu1 %v1021_v32  ;;  %v29_v31 = vld [vmem:[%s3935_s1 + $0x18] sm:$0xff] }
 0xa33   :  { %v1320_v32 = vpack.c.bf16 %v29_v31, %v28_v29 }
 0xa43   :  { %1042 = vrot.lane.b32.xlu1 %v3412_v11, %s3340_s22 }
 0xa85   :  { %v1032_v33 = vpop.xlane.xlu0 %1031 }
 0xa86   :  { %3273 = vrcp.f32 %v1032_v33 }
 0xa90   :  { %v3274_v34 = vpop.eup %3273 }
 0xa91   :  { %v1038_v36 = vmul.f32 %v3274_v34, %v3272_v17 }
 0xa93   :  { %v1040_v39 = vpack.c.bf16 %v1038_v36, %v1038_v36 }
 0xabf   :  { %v1023_v21 = vpop.xlane.xlu1 %1022 }
 0xac0   :  { %v1025_v35 = vsub.f32 %v1017_v28, %v1023_v21  ;;  %v27_v28 = vld [vmem:[%s3935_s1 + $0x8] sm:$0xff] }
 0xac1   :  { %v1319_v30 = vpack.c.bf16 %v27_v28, %v26_v27 }
 0xac2   :  { %v1028_v37 = vmul.f32 1.442695, %v1025_v35 }
 0xac3   :  { %v1043_v24 = vpop.permute.xlu1 %1042 }
 0xac4   :  { %3275 = vpow2.f32 %v1028_v37  ;;  %v1048_v38 = vsel %vm231_vm3, %v1043_v24, 0 }
 0xac5   :  { %3044 = vmatpush3.bf16.msra.mxu0 %v1048_v38 }
 0xac6   :  { %3055 = vmatprep.subr.bf16.mxu0 %v3328_v0 }
 0xac8   :  { %3046 = vmatmul.mubr.msk.bf16.vlgmr.msra.gmra.mrb[32].mxu0 %vm104_vm2, %v1040_v39 }
 0xac9   :  { %3057 = vmatprep.mubr.msk.bf16.mxu0 %vm3329_vm0, %v3328_v0  ;;  %3056 = vmatpush3.bf16.msra.mxu0 %v1144_v42  ;;  %v3652_v42 = vld [vmem:[%s3933_s5 + $0x3] ss:$0 sm:$0xff] }
 0xace   :  { %v3276_v11 = vpop.eup %3275 }
 0xacf   :  { %v1033_v40 = vsel %vm104_vm2, %v3276_v11, 0.0 }
 0xad0   :  { %1034 = vadd.xlane.f32.xlu0 %v1033_v40 }
 0xae6   :  { %1090 = vrot.lane.b32.xlu0 %v3417_v14, %s3340_s22 }
 0xb5d   :  { %v1035_v43 = vpop.xlane.xlu0 %1034 }
 0xb5e   :  { %3277 = vrcp.f32 %v1035_v43 }
 0xb61   :  { %v1091_v44 = vpop.permute.xlu0 %1090 }
 0xb62   :  { %v1096_v45 = vsel %vm231_vm3, %v1091_v44, 0 }
 0xb63   :  { %3050 = vmatpush3.bf16.msra.mxu1 %v1096_v45 }
 0xb64   :  { %3061 = vmatprep.subr.bf16.mxu1 %v3328_v0 }
 0xb68   :  { %v3278_v46 = vpop.eup %3277 }
 0xb69   :  { %v1039_v47 = vmul.f32 %v3278_v46, %v3276_v11 }
 0xb6b   :  { %v1041_v48 = vpack.c.bf16 %v1039_v47, %v1039_v47  ;;  %v3668_v47 = vld [vmem:[%s3933_s5 + $0x1] ss:$0 sm:$0xff] }
 0xb6d   :  { %3052 = vmatmul.mubr.msk.bf16.vlgmr.msra.gmra.mrb[40].mxu1 %vm104_vm2, %v1041_v48 }
 0xb6e   :  { %3065 = vmatprep.mubr.msk.bf16.mxu1 %vm3329_vm0, %v3328_v0 }
 0xb9b   :  { %v1084_v14 = vpop.f32.mrb[32].mxu0 }
 0xb9c   :  { %v3047_v49 = vpop.f32.mrb[33].mxu0 }
 0xb9d   :  { %v1087_v50 = vpop.f32.mrb[34].mxu0 }
 0xb9e   :  { %v3048_v51 = vpop.f32.mrb[35].mxu0 }
 0xc40   :  { %v1132_v52 = vpop.f32.mrb[40].mxu1 }
 0xc41   :  { %v1139_v53 = vpack.c.bf16 %v1132_v52, %v1084_v14  ;;  %v3053_v54 = vpop.f32.mrb[41].mxu1 }
 0xc42   :  { %v1135_v55 = vpop.f32.mrb[42].mxu1 }
 0xc43   :  { %v3054_v56 = vpop.f32.mrb[43].mxu1  ;;  %3058 = vmatmul.mubr.msk.bf16.vlgmr.msra.gmra.mrb[36].mxu0 %vm104_vm2, %v1139_v53 }
 0xc44   :  { %3073 = vmatprep.mubr.msk.bf16.mxu0 %vm54_vm1, %v1319_v30 }
 0xd16   :  { %v1180_v57 = vpop.f32.mrb[36].mxu0 }
 0xd17   :  { %v1187_v59 = vadd.f32 %v1180_v57, %v914_v20  ;;  %v3059_v60 = vpop.f32.mrb[37].mxu0 }
 0xd18   :  { %v1183_v61 = vpop.f32.mrb[38].mxu0 }
 0xd19   :  { %v1196_v62 = vadd.f32 %v3602_v58, %v1187_v59  ;;  %v1188_v63 = vadd.f32 %v1183_v61, %v915_v25  ;;  %v3060_v1 = vpop.f32.mrb[39].mxu0  ;;  %v3235_v25 = vld [vmem:[%s3931_s2 + $0x4] ss:$8 sps:$4 sm:$0xff]  }
 0xd1a   :  { %3069 = vmatprep.subr.bf16.mxu0 %v3235_v25 }
 0xd1b   :  { %v1197_v2 = vadd.f32 %v3602_v58, %v1188_v63  ;;  %v1198_v5 = vadd.f32 %v1196_v62, %v3392_v3  ;;  %3070 = vmatpush3.bf16.msra.mxu0 %v3235_v25 }
 0xd1c   :  { %3071 = vmatprep.subr.bf16.mxu0 %v3236_v26 }
 0xd1d   :  { %v1200_v7 = vsel %vm54_vm1, %v1198_v5, 0.0  ;;  %v1199_v8 = vadd.f32 %v1197_v2, %v3397_v4 }
 0xd1e   :  { %1201 = vadd.xlane.f32.xlu1 %v1200_v7 }
 0xd1f   :  { %v1203_v9 = vsel %vm54_vm1, %v1199_v8, 0.0  ;;  %3072 = vmatpush3.bf16.msra.mxu0 %v3236_v26 }
 0xd20   :  { %1204 = vadd.xlane.f32.xlu0 %v1203_v9  ;;  %3083 = vmatprep.subr.bf16.mxu0 %v3328_v0 }
 0xd22   :  { %3074 = vmatmul.mubr.msk.bf16.vlgmr.msra.gmra.mrb[40].mxu0 %vm54_vm1, %v1320_v32 }
 0xd23   :  { %3085 = vmatprep.mubr.msk.bf16.mxu0 %vm3329_vm0, %v3328_v0 }
 0xd2f   :  { %1262 = vrot.lane.b32.xlu1 %v3233_v10, %s3341_s29 }
 0xdab   :  { %v1202_v12 = vpop.xlane.xlu1 %1201 }
 0xdac   :  { %v1207_v13 = vmul.f32 0.03125, %v1202_v12 }
 0xdad   :  { %v1205_v15 = vpop.xlane.xlu0 %1204 }
 0xdae   :  { %v1209_v16 = vsub.f32 %v1198_v5, %v1207_v13  ;;  %v1208_v3 = vmul.f32 0.03125, %v1205_v15 }
 0xdaf   :  { %v1263_v17 = vpop.permute.xlu1 %1262 }
 0xdb0   :  { %v1210_v18 = vsub.f32 %v1199_v8, %v1208_v3  ;;  %v1211_v19 = vmul.f32 %v1209_v16, %v1209_v16  ;;  %3062 = vmatpush3.bf16.msra.mxu1 %v1263_v17 }
 0xdb1   :  { %3063 = vmatprep.subr.bf16.mxu1 %v3328_v0 }
 0xdb2   :  { %v1213_v4 = vsel %vm54_vm1, %v1211_v19, 0.0  ;;  %v1212_v20 = vmul.f32 %v1210_v18, %v1210_v18 }
 0xdb3   :  { %1214 = vadd.xlane.f32.xlu1 %v1213_v4 }
 0xdb4   :  { %v1216_v22 = vsel %vm54_vm1, %v1212_v20, 0.0 }
 0xdb5   :  { %1217 = vadd.xlane.f32.xlu0 %v1216_v22 }
 0xdc4   :  { %1264 = vrot.lane.b32.xlu1 %v3234_v23, %s3341_s29 }
 0xdc8   :  { %1268 = vrot.lane.b32.xlu1 %v3409_v6, %s3341_s29 }
 0xdcb   :  { %1227 = vrot.lane.b32.xlu0 %v3602_v58, %s3341_s29 }
 0xdf5   :  { %v3075_v48 = vpop.f32.mrb[40].mxu0 }
 0xdf6   :  { %v1389_v14 = vadd.f32 %v3075_v48, %v3668_v47  ;;  %v1380_v49 = vpop.f32.mrb[41].mxu0 }
 0xdf7   :  { %v1381_v50 = vadd.f32 %v3668_v47, %v1380_v49  ;;  %v3076_v51 = vpop.f32.mrb[42].mxu0 }
 0xdf8   :  { %v1392_v52 = vadd.f32 %v3076_v51, %v3668_v47  ;;  %v1383_v53 = vpop.f32.mrb[43].mxu0 }
 0xdf9   :  { %v1384_v54 = vadd.f32 %v3668_v47, %v1383_v53 }
 0xdfa   :  { %v3674_v55 = vpack.c.bf16 %v1392_v52, %v1389_v14 }
 0xdfb   :  { %v3676_v56 = vpack.c.bf16 %v1384_v54, %v1381_v50 }
 0xdfc   :  { %v1449_v57 = vsel %vm104_vm2, %v3674_v55, 0 }
 0xdfd   :  { %v1403_v59 = vsel %vm104_vm2, %v3676_v56, 0  ;;  %3084 = vmatpush3.bf16.xpose.msra.mxu0 %v1449_v57 }
 0xdfe   :  { %3095 = vmatprep.subr.bf16.mxu0 %v3328_v0 }
 0xe40   :  { %v1215_v6 = vpop.xlane.xlu1 %1214 }
 0xe41   :  { %v1219_v33 = vmul.f32 0.03125, %v1215_v6 }
 0xe42   :  { %v1218_v34 = vpop.xlane.xlu0 %1217 }
 0xe43   :  { %v1221_v21 = vadd.f32 1e-05, %v1219_v33  ;;  %v1220_v35 = vmul.f32 0.03125, %v1218_v34 }
 0xe44   :  { %v1265_v36 = vpop.permute.xlu1 %1264 }
 0xe45   :  { %3279 = vrsqrt.f32 %v1221_v21  ;;  %v1222_v37 = vadd.f32 1e-05, %v1220_v35  ;;  %3064 = vmatpush3.bf16.msra.mxu1 %v1265_v36 }
 0xe46   :  { %3077 = vmatprep.subr.bf16.mxu1 %v3328_v0  ;;  %v1228_v38 = vpop.permute.xlu0 %1227 }
 0xe47   :  { %3281 = vrsqrt.f32 %v1222_v37 }
 0xe48   :  { %v1269_v60 = vpop.permute.xlu1 %1268 }
 0xe4f   :  { %v3280_v24 = vpop.eup %3279 }
 0xe50   :  { %v1225_v39 = vmul.f32 %v3280_v24, %v1209_v16 }
 0xe51   :  { %v3282_v11 = vpop.eup %3281 }
 0xe52   :  { %v1226_v40 = vmul.f32 %v3282_v11, %v1210_v18  ;;  %v1230_v41 = vmul.f32 %v1228_v38, %v1225_v39 }
 0xe54   :  { %v1231_v43 = vmul.f32 %v1228_v38, %v1226_v40  ;;  %v3655_v44 = vadd.f32 %v3652_v42, %v1230_v41 }
 0xe56   :  { %v3658_v45 = vadd.f32 %v3652_v42, %v1231_v43 }
 0xe58   :  { %v1245_v46 = vpack.c.bf16 %v3658_v45, %v3655_v44 }
 0xe5a   :  { %3066 = vmatmul.mubr.msk.bf16.vlgmr.msra.gmra.mrb[44].mxu1 %vm54_vm1, %v1245_v46 }
 0xe5b   :  { %3079 = vmatprep.mubr.msk.bf16.mxu1 %vm3329_vm0, %v3328_v0  ;;  %3078 = vmatpush3.bf16.xpose.msra.mxu1 %v1403_v59 }
 0xe5c   :  { %3089 = vmatprep.subr.bf16.mxu1 %v3328_v0 }
 0xf2d   :  { %v1308_v61 = vpop.f32.mrb[44].mxu1 }
 0xf2e   :  { %v1309_v62 = vadd.f32 %v1308_v61, %v1269_v60  ;;  %v3067_v63 = vpop.f32.mrb[45].mxu1 }
 0xf2f   :  { %v1311_v1 = vpop.f32.mrb[46].mxu1 }
 0xf30   :  { %v3684_v2 = vpack.c.bf16 %v1309_v62, %v1309_v62  ;;  %v1312_v5 = vadd.f32 %v1311_v1, %v1269_v60  ;;  %v3068_v7 = vpop.f32.mrb[47].mxu1 }
 0xf32   :  { %v3686_v8 = vpack.c.bf16 %v1312_v5, %v1312_v5  ;;  %3080 = vmatmul.mubr.msk.bf16.vlgmr.msra.gmra.mrb[48].mxu1 %vm104_vm2, %v3684_v2 }
 0xf33   :  { %3091 = vmatprep.mubr.msk.bf16.mxu1 %vm3329_vm0, %v3328_v0 }
 0xf34   :  { %3086 = vmatmul.mubr.msk.bf16.vlgmr.msra.gmra.mrb[44].mxu0 %vm104_vm2, %v3686_v8 }
 0xf35   :  { %3097 = vmatprep.mubr.msk.bf16.mxu0 %vm3329_vm0, %v3328_v0 }
0x1005   :  { %v1439_v9 = vpop.f32.mrb[48].mxu1 }
0x1006   :  { %v1491_v10 = vmul.f32 0.35355338, %v1439_v9  ;;  %v3081_v12 = vpop.f32.mrb[49].mxu1 }
0x1007   :  { %v1442_v13 = vpop.f32.mrb[50].mxu1  ;;  %v1485_v15 = vpop.f32.mrb[44].mxu0 }
0x1008   :  { %v1492_v16 = vmul.f32 0.35355338, %v1485_v15  ;;  %v3082_v3 = vpop.f32.mrb[51].mxu1  ;;  %v3087_v17 = vpop.f32.mrb[45].mxu0  ;;  %v1494_v18 = vsel %vm1493_vm4, %v1491_v10, -inf }
0x1009   :  { %v1488_v19 = vpop.f32.mrb[46].mxu0  ;;  %1495 = vmax.xlane.f32.xlu0 %v1494_v18  ;;  %v3238_v3 = vld [vmem:[%s3934_s3] ss:$0 sps:$4 sm:$0xff]  }
0x100a   :  { %v3088_v4 = vpop.f32.mrb[47].mxu0  ;;  %v1497_v20 = vsel %vm1493_vm4, %v1492_v16, -inf }
0x100b   :  { %1498 = vmax.xlane.f32.xlu1 %v1497_v20 }
0x101c   :  { %1519 = vrot.lane.b32.xlu1 %v3676_v56, %s3330_s0 }
0x1020   :  { %1617 = vrot.lane.b32.xlu1 %v3676_v56, %s3333_s9 }
0x1024   :  { %1668 = vrot.lane.b32.xlu1 %v3674_v55, %s3333_s9 }
0x1028   :  { %1666 = vrot.lane.b32.xlu1 %v3686_v8, %s3333_s9 }
0x1096   :  { %v1496_v22 = vpop.xlane.xlu0 %1495 }
0x1097   :  { %v1500_v23 = vsub.f32 %v1491_v10, %v1496_v22 }
0x1098   :  { %v1499_v25 = vpop.xlane.xlu1 %1498 }
0x1099   :  { %v1502_v26 = vmul.f32 1.442695, %v1500_v23  ;;  %v1501_v27 = vsub.f32 %v1492_v16, %v1499_v25  ;;  %v3237_v16 = vld [vmem:[%s3934_s3 + $0x4] ss:$0 sps:$4 sm:$0xff]  }
0x109b   :  { %3283 = vpow2.f32 %v1502_v26  ;;  %v1504_v28 = vmul.f32 1.442695, %v1501_v27 }
0x109c   :  { %v1520_v29 = vpop.permute.xlu1 %1519 }
0x109d   :  { %3285 = vpow2.f32 %v1504_v28  ;;  %3090 = vmatpush3.bf16.msra.mxu1 %v1520_v29 }
0x109e   :  { %3101 = vmatprep.subr.bf16.mxu1 %v3328_v0 }
0x10a0   :  { %v1618_v36 = vpop.permute.xlu1 %1617 }
0x10a1   :  { %v1623_v39 = vsel %vm104_vm2, %v1618_v36, 0 }
0x10a4   :  { %v1669_v40 = vpop.permute.xlu1 %1668 }
0x10a5   :  { %v3284_v30 = vpop.eup %3283  ;;  %v1674_v43 = vsel %vm104_vm2, %v1669_v40, 0 }
0x10a6   :  { %v1506_v31 = vsel %vm1493_vm4, %v3284_v30, 0.0 }
0x10a7   :  { %v3286_v32 = vpop.eup %3285  ;;  %1507 = vadd.xlane.f32.xlu0 %v1506_v31 }
0x10a8   :  { %v1509_v6 = vsel %vm1493_vm4, %v3286_v32, 0.0  ;;  %v1667_v48 = vpop.permute.xlu1 %1666 }
0x10ab   :  { %1510 = vadd.xlane.f32.xlu0 %v1509_v6 }
0x10c1   :  { %1566 = vrot.lane.b32.xlu0 %v3674_v55, %s3330_s0 }
0x10c5   :  { %1615 = vrot.lane.b32.xlu0 %v3684_v2, %s3333_s9 }
0x1134   :  { %v1508_v33 = vpop.xlane.xlu0 %1507 }
0x1135   :  { %3287 = vrcp.f32 %v1508_v33 }
0x1138   :  { %v1511_v34 = vpop.xlane.xlu0 %1510 }
0x1139   :  { %3289 = vrcp.f32 %v1511_v34 }
0x113c   :  { %v1567_v21 = vpop.permute.xlu0 %1566 }
0x113d   :  { %3096 = vmatpush3.bf16.msra.mxu0 %v1567_v21 }
0x113e   :  { %3107 = vmatprep.subr.bf16.mxu0 %v3328_v0 }
0x113f   :  { %v3288_v35 = vpop.eup %3287 }
0x1140   :  { %v1514_v37 = vmul.f32 %v3288_v35, %v3284_v30  ;;  %v1616_v46 = vpop.permute.xlu0 %1615 }
0x1142   :  { %v1516_v24 = vpack.c.bf16 %v1514_v37, %v1514_v37 }
0x1143   :  { %v3290_v38 = vpop.eup %3289 }
0x1144   :  { %v1515_v11 = vmul.f32 %v3290_v38, %v3286_v32  ;;  %3092 = vmatmul.mubr.msk.bf16.vlgmr.msra.gmra.mrb[52].mxu1 %vm1493_vm4, %v1516_v24 }
0x1145   :  { %3102 = vmatpush3.bf16.xpose.msra.mxu1 %v1623_v39  ;;  %3103 = vmatprep.mubr.msk.bf16.mxu1 %vm3329_vm0, %v3328_v0 }
0x1146   :  { %v1517_v41 = vpack.c.bf16 %v1515_v11, %v1515_v11  ;;  %3113 = vmatprep.subr.bf16.mxu1 %v3328_v0 }
0x1148   :  { %3098 = vmatmul.mubr.msk.bf16.vlgmr.msra.gmra.mrb[48].mxu0 %vm1493_vm4, %v1517_v41 }
0x1149   :  { %3108 = vmatpush3.bf16.xpose.msra.mxu0 %v1674_v43  ;;  %3109 = vmatprep.mubr.msk.bf16.mxu0 %vm3329_vm0, %v3328_v0 }
0x114a   :  { %3119 = vmatprep.subr.bf16.mxu0 %v3328_v0 }
0x114c   :  { %3104 = vmatmul.mubr.msk.bf16.vlgmr.msra.gmra.mrb[56].mxu1 %vm104_vm2, %v1616_v46 }
0x114d   :  { %3115 = vmatprep.mubr.msk.bf16.mxu1 %vm3329_vm0, %v3328_v0 }
0x1150   :  { %3110 = vmatmul.mubr.msk.bf16.vlgmr.msra.gmra.mrb[52].mxu0 %vm104_vm2, %v1667_v48 }
0x1151   :  { %3121 = vmatprep.mubr.msk.bf16.mxu0 %vm3329_vm0, %v3328_v0 }
0x1217   :  { %v3730_v14 = vpop.f32.mrb[52].mxu1 }
0x1218   :  { %v3093_v49 = vpop.f32.mrb[53].mxu1 }
0x1219   :  { %v1562_v50 = vpop.f32.mrb[54].mxu1 }
0x121a   :  { %v3094_v51 = vpop.f32.mrb[55].mxu1 }
0x121b   :  { %v3732_v52 = vpop.f32.mrb[48].mxu0 }
0x121c   :  { %v1613_v53 = vpack.c.bf16 %v3732_v52, %v3730_v14  ;;  %v3099_v54 = vpop.f32.mrb[49].mxu0 }
0x121d   :  { %v1609_v57 = vpop.f32.mrb[50].mxu0 }
0x121e   :  { %v3100_v59 = vpop.f32.mrb[51].mxu0 }
0x121f   :  { %v1659_v60 = vpop.f32.mrb[56].mxu1 }
0x1220   :  { %v1716_v61 = vmul.f32 0.35355338, %v1659_v60  ;;  %v3105_v62 = vpop.f32.mrb[57].mxu1 }
0x1221   :  { %v1662_v63 = vpop.f32.mrb[58].mxu1 }
0x1222   :  { %v3106_v1 = vpop.f32.mrb[59].mxu1  ;;  %v1718_v5 = vsel %vm1493_vm4, %v1716_v61, -inf }
0x1223   :  { %v1710_v7 = vpop.f32.mrb[52].mxu0  ;;  %1719 = vmax.xlane.f32.xlu0 %v1718_v5 }
0x1224   :  { %v1717_v9 = vmul.f32 0.35355338, %v1710_v7  ;;  %v3111_v10 = vpop.f32.mrb[53].mxu0 }
0x1225   :  { %v1713_v12 = vpop.f32.mrb[54].mxu0 }
0x1226   :  { %v3112_v13 = vpop.f32.mrb[55].mxu0  ;;  %v1721_v15 = vsel %vm1493_vm4, %v1717_v9, -inf  ;;  %v3239_v12 = vld [vmem:[%s3934_s3 + $0x8] ss:$0 sps:$4 sm:$0xff]  }
0x1227   :  { %1722 = vmax.xlane.f32.xlu1 %v1721_v15 }
0x1238   :  { %1742 = vrot.lane.b32.xlu1 %v3676_v56, %s3332_s8 }
0x123c   :  { %1839 = vrot.lane.b32.xlu1 %v3237_v16, %s3330_s0 }
0x1240   :  { %1891 = vrot.lane.b32.xlu1 %v3238_v3, %s3330_s0 }
0x1244   :  { %1992 = vrot.lane.b32.xlu1 %v3674_v55, %s3335_s11 }
0x1248   :  { %1990 = vrot.lane.b32.xlu1 %v3686_v8, %s3335_s11 }
0x12b0   :  { %v1720_v17 = vpop.xlane.xlu0 %1719 }
0x12b1   :  { %v1724_v18 = vsub.f32 %v1716_v61, %v1720_v17 }
0x12b3   :  { %v1726_v19 = vmul.f32 1.442695, %v1724_v18 }
0x12b4   :  { %v1723_v4 = vpop.xlane.xlu1 %1722 }
0x12b5   :  { %3291 = vpow2.f32 %v1726_v19  ;;  %v1725_v20 = vsub.f32 %v1717_v9, %v1723_v4 }
0x12b7   :  { %v1728_v22 = vmul.f32 1.442695, %v1725_v20 }
0x12b8   :  { %v1743_v23 = vpop.permute.xlu1 %1742 }
0x12b9   :  { %3293 = vpow2.f32 %v1728_v22  ;;  %3114 = vmatpush3.bf16.msra.mxu1 %v1743_v23 }
0x12ba   :  { %3125 = vmatprep.subr.bf16.mxu1 %v3328_v0 }
0x12bc   :  { %v1840_v6 = vpop.permute.xlu1 %1839 }
0x12bd   :  { %v1845_v34 = vsel %vm231_vm3, %v1840_v6, 0 }
0x12bf   :  { %v3292_v25 = vpop.eup %3291 }
0x12c0   :  { %v1730_v26 = vsel %vm1493_vm4, %v3292_v25, 0.0  ;;  %v1892_v37 = vpop.permute.xlu1 %1891 }
0x12c1   :  { %1731 = vadd.xlane.f32.xlu0 %v1730_v26  ;;  %v1897_v24 = vsel %vm231_vm3, %v1892_v37, 0 }
0x12c3   :  { %v3294_v27 = vpop.eup %3293 }
0x12c4   :  { %v1733_v28 = vsel %vm1493_vm4, %v3294_v27, 0.0  ;;  %v1993_v39 = vpop.permute.xlu1 %1992 }
0x12c5   :  { %1734 = vadd.xlane.f32.xlu0 %v1733_v28  ;;  %v1998_v11 = vsel %vm104_vm2, %v1993_v39, 0 }
0x12c8   :  { %v1991_v40 = vpop.permute.xlu1 %1990 }
0x12db   :  { %1788 = vrot.lane.b32.xlu0 %v3674_v55, %s3332_s8 }
0x12df   :  { %1942 = vrot.lane.b32.xlu0 %v3676_v56, %s3335_s11 }
0x12e3   :  { %1940 = vrot.lane.b32.xlu0 %v3684_v2, %s3335_s11 }
0x134e   :  { %v1732_v29 = vpop.xlane.xlu0 %1731 }
0x134f   :  { %3295 = vrcp.f32 %v1732_v29 }
0x1352   :  { %v1735_v30 = vpop.xlane.xlu0 %1734 }
0x1353   :  { %3297 = vrcp.f32 %v1735_v30 }
0x1356   :  { %v1789_v31 = vpop.permute.xlu0 %1788 }
0x1357   :  { %3120 = vmatpush3.bf16.msra.mxu0 %v1789_v31 }
0x1358   :  { %3131 = vmatprep.subr.bf16.mxu0 %v3328_v0 }
0x1359   :  { %v3296_v32 = vpop.eup %3295 }
0x135a   :  { %v1738_v33 = vmul.f32 %v3296_v32, %v3292_v25  ;;  %v1943_v14 = vpop.permute.xlu0 %1942 }
0x135c   :  { %v1740_v21 = vpack.c.bf16 %v1738_v33, %v1738_v33 }
0x135d   :  { %v3298_v35 = vpop.eup %3297 }
0x135e   :  { %v1739_v36 = vmul.f32 %v3298_v35, %v3294_v27  ;;  %3116 = vmatmul.mubr.msk.bf16.vlgmr.msra.gmra.mrb[60].mxu1 %vm1493_vm4, %v1740_v21  ;;  %v1941_v60 = vpop.permute.xlu0 %1940 }
0x135f   :  { %3126 = vmatpush3.bf16.msra.mxu1 %v1845_v34  ;;  %3127 = vmatprep.mubr.msk.bf16.mxu1 %vm3329_vm0, %v3328_v0 }
0x1360   :  { %v1741_v38 = vpack.c.bf16 %v1739_v36, %v1739_v36  ;;  %3137 = vmatprep.subr.bf16.mxu1 %v3328_v0 }
0x1362   :  { %3122 = vmatmul.mubr.msk.bf16.vlgmr.msra.gmra.mrb[56].mxu0 %vm1493_vm4, %v1741_v38 }
0x1363   :  { %3132 = vmatpush3.bf16.msra.mxu0 %v1897_v24  ;;  %3133 = vmatprep.mubr.msk.bf16.mxu0 %vm3329_vm0, %v3328_v0 }
0x1364   :  { %3143 = vmatprep.subr.bf16.mxu0 %v3328_v0 }
0x136a   :  { %3134 = vmatmul.mubr.msk.bf16.vlgmr.msra.gmra.mrb[60].mxu0 %vm104_vm2, %v1613_v53  ;;  %v1948_v53 = vsel %vm104_vm2, %v1943_v14, 0 }
0x136b   :  { %3145 = vmatprep.mubr.msk.bf16.mxu0 %vm3329_vm0, %v3328_v0 }
0x136c   :  { %3144 = vmatpush3.bf16.xpose.msra.mxu0 %v1998_v11 }
0x136d   :  { %3155 = vmatprep.subr.bf16.mxu0 %v3328_v0 }
0x1373   :  { %3146 = vmatmul.mubr.msk.bf16.vlgmr.msra.gmra.mrb[64].mxu0 %vm104_vm2, %v1991_v40 }
0x1374   :  { %3157 = vmatprep.mubr.msk.bf16.mxu0 %vm3329_vm0, %v3328_v0 }
0x1431   :  { %v1782_v41 = vpop.f32.mrb[60].mxu1 }
0x1432   :  { %v3117_v43 = vpop.f32.mrb[61].mxu1 }
0x1433   :  { %v1785_v46 = vpop.f32.mrb[62].mxu1 }
0x1434   :  { %v3118_v48 = vpop.f32.mrb[63].mxu1 }
0x1435   :  { %v1828_v49 = vpop.f32.mrb[56].mxu0 }
0x1436   :  { %v1835_v50 = vpack.c.bf16 %v1828_v49, %v1782_v41  ;;  %v3123_v51 = vpop.f32.mrb[57].mxu0 }
0x1437   :  { %v1831_v52 = vpop.f32.mrb[58].mxu0 }
0x1438   :  { %v3124_v54 = vpop.f32.mrb[59].mxu0  ;;  %3128 = vmatmul.mubr.msk.bf16.vlgmr.msra.gmra.mrb[64].mxu1 %vm104_vm2, %v1835_v50 }
0x1439   :  { %3138 = vmatpush3.bf16.xpose.msra.mxu1 %v1948_v53  ;;  %3139 = vmatprep.mubr.msk.bf16.mxu1 %vm3329_vm0, %v3328_v0 }
0x143a   :  { %3149 = vmatprep.subr.bf16.mxu1 %v3328_v0 }
0x143d   :  { %v1933_v57 = vpop.f32.mrb[60].mxu0 }
0x143e   :  { %v3135_v59 = vpop.f32.mrb[61].mxu0 }
0x143f   :  { %v1936_v61 = vpop.f32.mrb[62].mxu0 }
0x1440   :  { %v3136_v62 = vpop.f32.mrb[63].mxu0  ;;  %3140 = vmatmul.mubr.msk.bf16.vlgmr.msra.gmra.mrb[68].mxu1 %vm104_vm2, %v1941_v60 }
0x1441   :  { %3151 = vmatprep.mubr.msk.bf16.mxu1 %vm3329_vm0, %v3328_v0 }
0x1446   :  { %v2034_v63 = vpop.f32.mrb[64].mxu0 }
0x1447   :  { %v2041_v1 = vmul.f32 0.35355338, %v2034_v63  ;;  %v3147_v5 = vpop.f32.mrb[65].mxu0 }
0x1448   :  { %v2037_v7 = vpop.f32.mrb[66].mxu0 }
0x1449   :  { %v3148_v9 = vpop.f32.mrb[67].mxu0  ;;  %v2045_v10 = vsel %vm1493_vm4, %v2041_v1, -inf }
0x144a   :  { %2046 = vmax.xlane.f32.xlu1 %v2045_v10 }
0x145b   :  { %2066 = vrot.lane.b32.xlu1 %v3676_v56, %s3336_s12 }
0x145f   :  { %2163 = vrot.lane.b32.xlu1 %v3239_v12, %s3330_s0 }
0x1463   :  { %2216 = vrot.lane.b32.xlu1 %v3676_v56, %s3339_s19 }
0x1467   :  { %2214 = vrot.lane.b32.xlu1 %v3684_v2, %s3339_s19 }
0x14d7   :  { %v2047_v13 = vpop.xlane.xlu1 %2046 }
0x14d8   :  { %v2049_v16 = vsub.f32 %v2041_v1, %v2047_v13 }
0x14da   :  { %v2052_v3 = vmul.f32 1.442695, %v2049_v16 }
0x14db   :  { %v2067_v15 = vpop.permute.xlu1 %2066 }
0x14dc   :  { %3150 = vmatpush3.bf16.msra.mxu1 %v2067_v15  ;;  %3299 = vpow2.f32 %v2052_v3 }
0x14dd   :  { %3161 = vmatprep.subr.bf16.mxu1 %v3328_v0 }
0x14df   :  { %v2164_v24 = vpop.permute.xlu1 %2163 }
0x14e0   :  { %v2169_v43 = vsel %vm231_vm3, %v2164_v24, 0 }
0x14e3   :  { %v2217_v11 = vpop.permute.xlu1 %2216 }
0x14e4   :  { %v2222_v41 = vsel %vm104_vm2, %v2217_v11, 0 }
0x14e6   :  { %v3300_v29 = vpop.eup %3299 }
0x14e7   :  { %v2057_v30 = vsel %vm1493_vm4, %v3300_v29, 0.0  ;;  %v2215_v48 = vpop.permute.xlu1 %2214 }
0x150b   :  { %v1881_v17 = vpop.f32.mrb[64].mxu1 }
0x150c   :  { %v3803_v18 = vadd.f32 %v1933_v57, %v1881_v17  ;;  %v3129_v19 = vpop.f32.mrb[65].mxu1 }
0x150d   :  { %v1884_v4 = vpop.f32.mrb[66].mxu1 }
0x150e   :  { %v3805_v20 = vadd.f32 %v1936_v61, %v1884_v4  ;;  %v3130_v22 = vpop.f32.mrb[67].mxu1 }
0x1513   :  { %v1984_v23 = vpop.f32.mrb[68].mxu1 }
0x1514   :  { %v2040_v25 = vmul.f32 0.35355338, %v1984_v23  ;;  %v3141_v26 = vpop.f32.mrb[69].mxu1 }
0x1515   :  { %v1987_v2 = vpop.f32.mrb[70].mxu1 }
0x1516   :  { %v3142_v27 = vpop.f32.mrb[71].mxu1  ;;  %v2042_v28 = vsel %vm1493_vm4, %v2040_v25, -inf }
0x1517   :  { %2043 = vmax.xlane.f32.xlu0 %v2042_v28 }
0x151b   :  { %2058 = vadd.xlane.f32.xlu0 %v2057_v30 }
0x15a4   :  { %v2044_v31 = vpop.xlane.xlu0 %2043 }
0x15a5   :  { %v2048_v32 = vsub.f32 %v2040_v25, %v2044_v31 }
0x15a7   :  { %v2050_v6 = vmul.f32 1.442695, %v2048_v32 }
0x15a8   :  { %v2059_v21 = vpop.xlane.xlu0 %2058 }
0x15a9   :  { %3301 = vpow2.f32 %v2050_v6 }
0x15aa   :  { %3303 = vrcp.f32 %v2059_v21 }
0x15b3   :  { %v3302_v33 = vpop.eup %3301 }
0x15b4   :  { %v2054_v34 = vsel %vm1493_vm4, %v3302_v33, 0.0  ;;  %v3304_v35 = vpop.eup %3303 }
0x15b5   :  { %2055 = vadd.xlane.f32.xlu0 %v2054_v34  ;;  %v2063_v37 = vmul.f32 %v3304_v35, %v3300_v29 }
0x15b7   :  { %v2065_v39 = vpack.c.bf16 %v2063_v37, %v2063_v37 }
0x15cb   :  { %2112 = vrot.lane.b32.xlu0 %v3674_v55, %s3336_s12 }
0x15cf   :  { %2266 = vrot.lane.b32.xlu0 %v3674_v55, %s3339_s19 }
0x15d3   :  { %2264 = vrot.lane.b32.xlu0 %v3686_v8, %s3339_s19 }
0x1642   :  { %v2056_v36 = vpop.xlane.xlu0 %2055 }
0x1643   :  { %3305 = vrcp.f32 %v2056_v36  ;;  %v3240_v36 = vld [vmem:[%s3934_s3 + $0xc] ss:$0 sps:$4 sm:$0xff]  }
0x1646   :  { %v2113_v38 = vpop.permute.xlu0 %2112 }
0x1647   :  { %3156 = vmatpush3.bf16.msra.mxu0 %v2113_v38 }
0x1648   :  { %3167 = vmatprep.subr.bf16.mxu0 %v3328_v0 }
0x164a   :  { %3158 = vmatmul.mubr.msk.bf16.vlgmr.msra.gmra.mrb[68].mxu0 %vm1493_vm4, %v2065_v39  ;;  %v2267_v52 = vpop.permute.xlu0 %2266 }
0x164b   :  { %3169 = vmatprep.mubr.msk.bf16.mxu0 %vm3329_vm0, %v3328_v0  ;;  %v2272_v60 = vsel %vm104_vm2, %v2267_v52, 0 }
0x164d   :  { %v3306_v40 = vpop.eup %3305 }
0x164e   :  { %v2062_v8 = vmul.f32 %v3306_v40, %v3302_v33  ;;  %v2265_v10 = vpop.permute.xlu0 %2264 }
0x1650   :  { %3168 = vmatpush3.bf16.xpose.msra.mxu0 %v2222_v41  ;;  %v2064_v46 = vpack.c.bf16 %v2062_v8, %v2062_v8 }
0x1651   :  { %3179 = vmatprep.subr.bf16.mxu0 %v3328_v0 }
0x1652   :  { %3152 = vmatmul.mubr.msk.bf16.vlgmr.msra.gmra.mrb[72].mxu1 %vm1493_vm4, %v2064_v46 }
0x1653   :  { %3162 = vmatpush3.bf16.msra.mxu1 %v2169_v43  ;;  %3163 = vmatprep.mubr.msk.bf16.mxu1 %vm3329_vm0, %v3328_v0 }
0x1654   :  { %3173 = vmatprep.subr.bf16.mxu1 %v3328_v0 }
0x1657   :  { %3170 = vmatmul.mubr.msk.bf16.vlgmr.msra.gmra.mrb[72].mxu0 %vm104_vm2, %v2215_v48 }
0x1658   :  { %3181 = vmatprep.mubr.msk.bf16.mxu0 %vm3329_vm0, %v3328_v0 }
0x171d   :  { %v2152_v14 = vpop.f32.mrb[68].mxu0 }
0x171e   :  { %v3159_v49 = vpop.f32.mrb[69].mxu0 }
0x171f   :  { %v2155_v50 = vpop.f32.mrb[70].mxu0 }
0x1720   :  { %v3160_v51 = vpop.f32.mrb[71].mxu0 }
0x1725   :  { %v2106_v53 = vpop.f32.mrb[72].mxu1 }
0x1726   :  { %v2159_v54 = vpack.c.bf16 %v2152_v14, %v2106_v53  ;;  %v3153_v57 = vpop.f32.mrb[73].mxu1 }
0x1727   :  { %v2109_v59 = vpop.f32.mrb[74].mxu1 }
0x1728   :  { %v3154_v61 = vpop.f32.mrb[75].mxu1  ;;  %3164 = vmatmul.mubr.msk.bf16.vlgmr.msra.gmra.mrb[76].mxu1 %vm104_vm2, %v2159_v54 }
0x1729   :  { %3174 = vmatpush3.bf16.xpose.msra.mxu1 %v2272_v60  ;;  %3175 = vmatprep.mubr.msk.bf16.mxu1 %vm3329_vm0, %v3328_v0 }
0x172a   :  { %v2258_v62 = vpop.f32.mrb[72].mxu0  ;;  %3185 = vmatprep.subr.bf16.mxu1 %v3328_v0 }
0x172b   :  { %v2314_v63 = vmul.f32 0.35355338, %v2258_v62  ;;  %v3171_v1 = vpop.f32.mrb[73].mxu0 }
0x172c   :  { %v2261_v5 = vpop.f32.mrb[74].mxu0 }
0x172d   :  { %v3172_v7 = vpop.f32.mrb[75].mxu0  ;;  %v2316_v9 = vsel %vm1493_vm4, %v2314_v63, -inf }
0x172e   :  { %2317 = vmax.xlane.f32.xlu1 %v2316_v9 }
0x1730   :  { %3176 = vmatmul.mubr.msk.bf16.vlgmr.msra.gmra.mrb[80].mxu1 %vm104_vm2, %v2265_v10 }
0x1731   :  { %3187 = vmatprep.mubr.msk.bf16.mxu1 %vm3329_vm0, %v3328_v0 }
0x17bb   :  { %v2318_v12 = vpop.xlane.xlu1 %2317 }
0x17bc   :  { %v2322_v13 = vsub.f32 %v2314_v63, %v2318_v12 }
0x17be   :  { %v2324_v15 = vmul.f32 1.442695, %v2322_v13 }
0x17c0   :  { %3307 = vpow2.f32 %v2324_v15 }
0x17ca   :  { %v3308_v29 = vpop.eup %3307 }
0x17cb   :  { %v2328_v30 = vsel %vm1493_vm4, %v3308_v29, 0.0 }
0x17fb   :  { %v2205_v16 = vpop.f32.mrb[76].mxu1 }
0x17fc   :  { %v3840_v3 = vadd.f32 %v2205_v16, %v3803_v18  ;;  %v3165_v17 = vpop.f32.mrb[77].mxu1 }
0x17fd   :  { %v2208_v19 = vpop.f32.mrb[78].mxu1 }
0x17fe   :  { %v3843_v4 = vadd.f32 %v2208_v19, %v3805_v20  ;;  %v3166_v22 = vpop.f32.mrb[79].mxu1 }
0x17ff   :  { %v3242_v22 = vld [vmem:[%s3931_s2 + $0x14] ss:$8 sps:$4 sm:$0xff]  }
0x1803   :  { %v2308_v23 = vpop.f32.mrb[80].mxu1 }
0x1804   :  { %v2315_v25 = vmul.f32 0.35355338, %v2308_v23  ;;  %v3177_v26 = vpop.f32.mrb[81].mxu1 }
0x1805   :  { %v2311_v2 = vpop.f32.mrb[82].mxu1 }
0x1806   :  { %v3178_v27 = vpop.f32.mrb[83].mxu1  ;;  %v2319_v28 = vsel %vm1493_vm4, %v2315_v25, -inf }
0x1807   :  { %2320 = vmax.xlane.f32.xlu0 %v2319_v28 }
0x180b   :  { %2329 = vadd.xlane.f32.xlu0 %v2328_v30 }
0x1821   :  { %2340 = vrot.lane.b32.xlu0 %v3676_v56, %s3338_s18 }
0x1825   :  { %2494 = vrot.lane.b32.xlu0 %v3602_v58, %s3330_s0 }
0x1894   :  { %v2321_v18 = vpop.xlane.xlu0 %2320 }
0x1895   :  { %v2323_v20 = vsub.f32 %v2315_v25, %v2321_v18 }
0x1897   :  { %v2326_v31 = vmul.f32 1.442695, %v2323_v20 }
0x1898   :  { %v2330_v32 = vpop.xlane.xlu0 %2329 }
0x1899   :  { %3309 = vpow2.f32 %v2326_v31 }
0x189a   :  { %3311 = vrcp.f32 %v2330_v32 }
0x189c   :  { %v2341_v6 = vpop.permute.xlu0 %2340 }
0x189d   :  { %3180 = vmatpush3.bf16.msra.mxu0 %v2341_v6 }
0x189e   :  { %3191 = vmatprep.subr.bf16.mxu0 %v3328_v0 }
0x18a0   :  { %v2495_v53 = vpop.permute.xlu0 %2494 }
0x18a3   :  { %v3310_v33 = vpop.eup %3309 }
0x18a4   :  { %v3312_v34 = vpop.eup %3311  ;;  %v2331_v21 = vsel %vm1493_vm4, %v3310_v33, 0.0 }
0x18a5   :  { %v2336_v35 = vmul.f32 %v3312_v34, %v3308_v29  ;;  %2332 = vadd.xlane.f32.xlu1 %v2331_v21 }
0x18a7   :  { %v2338_v56 = vpack.c.bf16 %v2336_v35, %v2336_v35  ;;  %v3243_v35 = vld [vmem:[%s3936_s4] sm:$0xff]  }
0x18a9   :  { %3182 = vmatmul.mubr.msk.bf16.vlgmr.msra.gmra.mrb[76].mxu0 %vm1493_vm4, %v2338_v56  ;;  %v3244_v56 = vld [vmem:[%s3936_s4 + $0x8] sm:$0xff]  }
0x18aa   :  { %3193 = vmatprep.mubr.msk.bf16.mxu0 %vm3329_vm0, %v3328_v0 }
0x18b6   :  { %2386 = vrot.lane.b32.xlu1 %v3674_v55, %s3338_s18 }
0x18ba   :  { %2437 = vrot.lane.b32.xlu1 %v3240_v36, %s3330_s0  ;;  %v3245_v36 = vld [vmem:[%s3936_s4 + $0x10] sm:$0xff]  }
0x1932   :  { %v2333_v37 = vpop.xlane.xlu1 %2332 }
0x1933   :  { %3313 = vrcp.f32 %v2333_v37  ;;  %v3246_v37 = vld [vmem:[%s3936_s4 + $0x18] sm:$0xff]  }
0x1936   :  { %v2387_v24 = vpop.permute.xlu1 %2386 }
0x1937   :  { %3186 = vmatpush3.bf16.msra.mxu1 %v2387_v24 }
0x1938   :  { %3197 = vmatprep.subr.bf16.mxu1 %v3328_v0 }
0x193a   :  { %v2438_v55 = vpop.permute.xlu1 %2437 }
0x193b   :  { %v2443_v40 = vsel %vm231_vm3, %v2438_v55, 0 }
0x193c   :  { %3192 = vmatpush3.bf16.msra.mxu0 %v2443_v40 }
0x193d   :  { %v3314_v38 = vpop.eup %3313  ;;  %3205 = vmatprep.subr.bf16.mxu0 %v3328_v0 }
0x193e   :  { %v2337_v39 = vmul.f32 %v3314_v38, %v3310_v33 }
0x1940   :  { %v2339_v11 = vpack.c.bf16 %v2337_v39, %v2337_v39 }
0x1942   :  { %3188 = vmatmul.mubr.msk.bf16.vlgmr.msra.gmra.mrb[84].mxu1 %vm1493_vm4, %v2339_v11 }
0x1943   :  { %3201 = vmatprep.mubr.msk.bf16.mxu1 %vm3329_vm0, %v3328_v0 }
0x197c   :  { %v2380_v8 = vpop.f32.mrb[76].mxu0 }
0x197d   :  { %v3183_v41 = vpop.f32.mrb[77].mxu0 }
0x197e   :  { %v2383_v43 = vpop.f32.mrb[78].mxu0 }
0x197f   :  { %v3184_v46 = vpop.f32.mrb[79].mxu0 }
0x1a15   :  { %v2426_v48 = vpop.f32.mrb[84].mxu1 }
0x1a16   :  { %v2433_v14 = vpack.c.bf16 %v2426_v48, %v2380_v8  ;;  %v3189_v49 = vpop.f32.mrb[85].mxu1 }
0x1a17   :  { %v2429_v50 = vpop.f32.mrb[86].mxu1 }
0x1a18   :  { %v3190_v51 = vpop.f32.mrb[87].mxu1  ;;  %3194 = vmatmul.mubr.msk.bf16.vlgmr.msra.gmra.mrb[80].mxu0 %vm104_vm2, %v2433_v14 }
0x1a19   :  { %3213 = vmatprep.mubr.msk.bf16.mxu0 %vm3329_vm0, %v3328_v0  ;;  %3206 = vmatpush3.bf16.msra.mxu0 %v3243_v35 }
0x1a1a   :  { %3207 = vmatprep.subr.bf16.mxu0 %v3328_v0 }
0x1a1d   :  { %3208 = vmatpush3.bf16.msra.mxu0 %v3244_v56 }
0x1a1e   :  { %3209 = vmatprep.subr.bf16.mxu0 %v3328_v0 }
0x1a21   :  { %3210 = vmatpush3.bf16.msra.mxu0 %v3245_v36 }
0x1a22   :  { %3211 = vmatprep.subr.bf16.mxu0 %v3328_v0 }
0x1a25   :  { %3212 = vmatpush3.bf16.msra.mxu0 %v3246_v37 }
0x1aeb   :  { %v2479_v52 = vpop.f32.mrb[80].mxu0 }
0x1aec   :  { %v2486_v54 = vadd.f32 %v2479_v52, %v3840_v3  ;;  %v3195_v57 = vpop.f32.mrb[81].mxu0 }
0x1aed   :  { %v2482_v59 = vpop.f32.mrb[82].mxu0 }
0x1aee   :  { %v2497_v60 = vadd.f32 %v2495_v53, %v2486_v54  ;;  %v2487_v61 = vadd.f32 %v2482_v59, %v3843_v4  ;;  %v3196_v62 = vpop.f32.mrb[83].mxu0  ;;  %v3241_v4 = vld [vmem:[%s3931_s2 + $0x4] ss:$8 sps:$4 sm:$0xff]  }
0x1af0   :  { %v2498_v63 = vadd.f32 %v2495_v53, %v2487_v61  ;;  %v2499_v1 = vadd.f32 %v2497_v60, %v3655_v44 }
0x1af2   :  { %v2501_v5 = vsel %vm54_vm1, %v2499_v1, 0.0  ;;  %v2500_v7 = vadd.f32 %v2498_v63, %v3658_v45 }
0x1af3   :  { %2502 = vadd.xlane.f32.xlu1 %v2501_v5 }
0x1af4   :  { %v2504_v9 = vsel %vm54_vm1, %v2500_v7, 0.0 }
0x1af5   :  { %2505 = vadd.xlane.f32.xlu0 %v2504_v9 }
0x1b04   :  { %2533 = vrot.lane.b32.xlu1 %v3652_v42, %s3330_s0 }
0x1b80   :  { %v2503_v10 = vpop.xlane.xlu1 %2502 }
0x1b81   :  { %v2507_v12 = vmul.f32 0.03125, %v2503_v10 }
0x1b82   :  { %v2506_v13 = vpop.xlane.xlu0 %2505 }
0x1b83   :  { %v2509_v15 = vsub.f32 %v2499_v1, %v2507_v12  ;;  %v2508_v16 = vmul.f32 0.03125, %v2506_v13 }
0x1b84   :  { %v2534_v23 = vpop.permute.xlu1 %2533 }
0x1b85   :  { %v2510_v3 = vsub.f32 %v2500_v7, %v2508_v16  ;;  %v2511_v17 = vmul.f32 %v2509_v15, %v2509_v15 }
0x1b87   :  { %v2513_v44 = vsel %vm54_vm1, %v2511_v17, 0.0  ;;  %v2512_v19 = vmul.f32 %v2510_v3, %v2510_v3 }
0x1b88   :  { %2514 = vadd.xlane.f32.xlu0 %v2513_v44 }
0x1b89   :  { %v2516_v45 = vsel %vm54_vm1, %v2512_v19, 0.0 }
0x1b8a   :  { %2517 = vadd.xlane.f32.xlu1 %v2516_v45 }
0x1b9b   :  { %2538 = vrot.lane.b32.xlu1 %v3652_v42, %s3331_s7 }
0x1b9e   :  { %2564 = vrot.lane.b32.xlu0 %v3241_v4, %s3331_s7 }
0x1b9f   :  { %2570 = vrot.lane.b32.xlu1 %v3668_v47, %s3331_s7 }
0x1ba2   :  { %2566 = vrot.lane.b32.xlu0 %v3242_v22, %s3331_s7 }
0x1ba6   :  { %2668 = vrot.lane.b32.xlu0 %v3602_v58, %s3331_s7 }
0x1c15   :  { %v2515_v25 = vpop.xlane.xlu0 %2514 }
0x1c16   :  { %v2519_v26 = vmul.f32 0.03125, %v2515_v25 }
0x1c17   :  { %v2518_v2 = vpop.xlane.xlu1 %2517 }
0x1c18   :  { %v2521_v27 = vadd.f32 1e-05, %v2519_v26  ;;  %v2520_v42 = vmul.f32 0.03125, %v2518_v2 }
0x1c19   :  { %v2565_v28 = vpop.permute.xlu0 %2564 }
0x1c1a   :  { %3315 = vrsqrt.f32 %v2521_v27  ;;  %v2522_v29 = vadd.f32 1e-05, %v2520_v42  ;;  %3198 = vmatpush3.bf16.msra.mxu1 %v2565_v28  ;;  %v3327_v28 = vld [vmem:[%s3933_s5 + $0x3] ss:$0 sm:$0xff] }
0x1c1b   :  { %3199 = vmatprep.subr.bf16.mxu1 %v3328_v0  ;;  %v2539_v32 = vpop.permute.xlu1 %2538 }
0x1c1c   :  { %3317 = vrsqrt.f32 %v2522_v29 }
0x1c1d   :  { %v2567_v30 = vpop.permute.xlu0 %2566 }
0x1c1e   :  { %3200 = vmatpush3.bf16.msra.mxu1 %v2567_v30 }
0x1c1f   :  { %v2571_v24 = vpop.permute.xlu1 %2570 }
0x1c21   :  { %v2669_v5 = vpop.permute.xlu0 %2668 }
0x1c24   :  { %v3316_v47 = vpop.eup %3315 }
0x1c25   :  { %v2525_v18 = vmul.f32 %v3316_v47, %v2509_v15 }
0x1c26   :  { %v3318_v20 = vpop.eup %3317 }
0x1c27   :  { %v2526_v31 = vmul.f32 %v3318_v20, %v2510_v3  ;;  %v2536_v58 = vmul.f32 %v2534_v23, %v2525_v18 }
0x1c29   :  { %v2537_v6 = vmul.f32 %v2534_v23, %v2526_v31  ;;  %v2541_v33 = vadd.f32 %v2539_v32, %v2536_v58 }
0x1c2b   :  { %v2542_v34 = vadd.f32 %v2539_v32, %v2537_v6 }
0x1c2d   :  { %v2547_v21 = vpack.c.bf16 %v2542_v34, %v2541_v33 }
0x1c2f   :  { %3202 = vmatmul.mubr.msk.bf16.vlgmr.msra.gmra.mrb[88].mxu1 %vm54_vm1, %v2547_v21 }
0x1d02   :  { %v2610_v38 = vpop.f32.mrb[88].mxu1 }
0x1d03   :  { %v2611_v39 = vadd.f32 %v2610_v38, %v2571_v24  ;;  %v3203_v11 = vpop.f32.mrb[89].mxu1 }
0x1d04   :  { %v2613_v55 = vpop.f32.mrb[90].mxu1 }
0x1d05   :  { %v2619_v40 = vmul.f32 0.044715, %v2611_v39  ;;  %v2614_v8 = vadd.f32 %v2613_v55, %v2571_v24  ;;  %v3204_v41 = vpop.f32.mrb[91].mxu1  ;;  %v2617_v59 = vmul.f32 0.5, %v2611_v39 }
0x1d07   :  { %v2621_v43 = vmul.f32 %v2619_v40, %v2611_v39  ;;  %v2620_v46 = vmul.f32 0.044715, %v2614_v8  ;;  %v2618_v60 = vmul.f32 0.5, %v2614_v8 }
0x1d09   :  { %v2623_v48 = vmul.f32 %v2621_v43, %v2611_v39  ;;  %v2622_v14 = vmul.f32 %v2620_v46, %v2614_v8 }
0x1d0b   :  { %v2625_v49 = vadd.f32 %v2623_v48, %v2611_v39  ;;  %v2624_v50 = vmul.f32 %v2622_v14, %v2614_v8 }
0x1d0d   :  { %v2627_v51 = vmul.f32 0.7978846, %v2625_v49  ;;  %v2626_v52 = vadd.f32 %v2624_v50, %v2614_v8 }
0x1d0f   :  { %3319 = vtanh.f32 %v2627_v51  ;;  %v2628_v53 = vmul.f32 0.7978846, %v2626_v52 }
0x1d11   :  { %3321 = vtanh.f32 %v2628_v53 }
0x1d19   :  { %v3320_v0 = vpop.eup %3319 }
0x1d1a   :  { %v2631_v54 = vadd.f32 1.0, %v3320_v0 }
0x1d1b   :  { %v3322_v57 = vpop.eup %3321 }
0x1d1c   :  { %v2632_v61 = vadd.f32 1.0, %v3322_v57  ;;  %v2633_v62 = vmul.f32 %v2631_v54, %v2617_v59 }
0x1d1e   :  { %v2634_v63 = vmul.f32 %v2632_v61, %v2618_v60 }
0x1d20   :  { %v2643_v1 = vpack.c.bf16 %v2634_v63, %v2633_v62 }
0x1d22   :  { %3214 = vmatmul.mubr.msk.bf16.vlgmr.msra.gmra.mrb[84].mxu0 %vm2671_vm5, %v2643_v1 }
0x1df5   :  { %v2709_v7 = vpop.f32.mrb[84].mxu0 }
0x1df6   :  { %v2710_v9 = vadd.f32 %v2709_v7, %v2669_v5  ;;  %v3215_v10 = vpop.f32.mrb[85].mxu0 }
0x1df7   :  { %v2712_v12 = vpop.f32.mrb[86].mxu0 }
0x1df8   :  { %v2716_v13 = vadd.f32 %v2710_v9, %v2541_v33  ;;  %v2713_v15 = vadd.f32 %v2712_v12, %v2669_v5  ;;  %v3216_v16 = vpop.f32.mrb[87].mxu0 }
0x1dfa   :  { %v2718_v3 = vsel %vm54_vm1, %v2716_v13, 0.0  ;;  %v2717_v17 = vadd.f32 %v2713_v15, %v2542_v34  ;;  %v2834_v34 = vld [vmem:[%s3933_s5 + $0x4] ss:$0 sm:$0xff] }
0x1dfb   :  { %2719 = vadd.xlane.f32.xlu1 %v2718_v3 }
0x1dfc   :  { %v2721_v44 = vsel %vm54_vm1, %v2717_v17, 0.0 }
0x1dfd   :  { %2722 = vadd.xlane.f32.xlu0 %v2721_v44 }
0x1e88   :  { %v2720_v19 = vpop.xlane.xlu1 %2719 }
0x1e89   :  { %v2724_v45 = vmul.f32 0.03125, %v2720_v19 }
0x1e8a   :  { %v2723_v4 = vpop.xlane.xlu0 %2722 }
0x1e8b   :  { %v2726_v22 = vsub.f32 %v2716_v13, %v2724_v45  ;;  %v2725_v23 = vmul.f32 0.03125, %v2723_v4 }
0x1e8d   :  { %v2727_v25 = vsub.f32 %v2717_v17, %v2725_v23  ;;  %v2728_v26 = vmul.f32 %v2726_v22, %v2726_v22 }
0x1e8f   :  { %v2730_v2 = vsel %vm54_vm1, %v2728_v26, 0.0  ;;  %v2729_v27 = vmul.f32 %v2727_v25, %v2727_v25 }
0x1e90   :  { %2731 = vadd.xlane.f32.xlu0 %v2730_v2 }
0x1e91   :  { %v2733_v42 = vsel %vm54_vm1, %v2729_v27, 0.0 }
0x1e92   :  { %2734 = vadd.xlane.f32.xlu1 %v2733_v42 }
0x1ea6   :  { %2744 = vrot.lane.b32.xlu0 %v3327_v28, %s3341_s29 }
0x1f1d   :  { %v2732_v29 = vpop.xlane.xlu0 %2731 }
0x1f1e   :  { %v2736_v30 = vmul.f32 0.03125, %v2732_v29 }
0x1f1f   :  { %v2735_v47 = vpop.xlane.xlu1 %2734 }
0x1f20   :  { %v2738_v18 = vadd.f32 1e-05, %v2736_v30  ;;  %v2737_v20 = vmul.f32 0.03125, %v2735_v47 }
0x1f21   :  { %v2745_v32 = vpop.permute.xlu0 %2744 }
0x1f22   :  { %3323 = vrsqrt.f32 %v2738_v18  ;;  %v2739_v31 = vadd.f32 1e-05, %v2737_v20 }
0x1f24   :  { %3325 = vrsqrt.f32 %v2739_v31 }
0x1f2c   :  { %v3324_v58 = vpop.eup %3323 }
0x1f2d   :  { %v2742_v6 = vmul.f32 %v3324_v58, %v2726_v22 }
0x1f2e   :  { %v3326_v33 = vpop.eup %3325 }
0x1f2f   :  { %v2743_v21 = vmul.f32 %v3326_v33, %v2727_v25  ;;  %v2747_v35 = vmul.f32 %v2745_v32, %v2742_v6 }
0x1f31   :  { %v2748_v56 = vmul.f32 %v2745_v32, %v2743_v21  ;;  %v2756_v36 = vadd.f32 %v2834_v34, %v2747_v35 }
0x1f33   :  { %v2757_v37 = vadd.f32 %v2834_v34, %v2748_v56  ;;  %2758 = vst.msk [vmem:[%s3937_s6] sm:$0xff] %vm54_vm1, %v2756_v36 }
0x1f35   :  { %2759 = vst.msk [vmem:[%s3937_s6 + $0x8] sm:$0xff] %vm54_vm1, %v2757_v37 }

</bundles_post_ra>
